<compile_context>
chip_gen: v6e
topology: v6e:2x2x1
jax: 0.10.0
libtpu: 0.0.40
codegen_flags: <defaults>
</compile_context>

<pallas_src>
import functools

import jax
import jax.numpy as jnp
from jax.experimental import pallas as pl
from jax.experimental.pallas import tpu as pltpu


def _round_up(x, m):
    return ((x + m - 1) // m) * m


def _cdiv(a, b):
    return -(-a // b)


def _epilogue_dtype_for_device():
    # v5e/v5p VPU & EUP have no bf16 datapath -> keep GELU/bias math in f32
    # there; v6e/v7x get packed bf16 vregs (half the VALU work).
    try:
        kind = jax.devices()[0].device_kind.lower()
    except Exception:
        kind = ""
    return jnp.float32 if "v5" in kind else jnp.bfloat16


# -----------------------------------------------------------------------------
# Pallas kernel: fused per-voxel MLP, channels on sublanes, voxels on lanes.
#   x_ref  : (C_in, TILE_S)   f32
#   w*_ref : (out,  in)       bf16   (Conv3d weight squeezed, PyTorch (out,in))
#   b*_ref : (out,  TILE_S)   f32 or bf16 (pre-broadcast, lane-replicated)
#   o_ref  : (C_out, TILE_S)  f32
# -----------------------------------------------------------------------------
def _voxel_mlp_kernel(x_ref, w1_ref, b1_ref, w2_ref, b2_ref, w3_ref, o_ref, *,
                      approximate_gelu):
    x = x_ref[...].astype(jnp.bfloat16)                              # (C_in, S)

    # layer 1: 1x1x1 conv == W1 @ x + b1, f32 MXU accumulation.
    a1 = jnp.dot(w1_ref[...], x, preferred_element_type=jnp.float32)
    h = jax.nn.gelu(a1.astype(b1_ref.dtype) + b1_ref[...],
                    approximate=approximate_gelu)                    # (h1, S)

    # layer 2
    a2 = jnp.dot(w2_ref[...], h.astype(jnp.bfloat16),
                 preferred_element_type=jnp.float32)
    h = jax.nn.gelu(a2.astype(b2_ref.dtype) + b2_ref[...],
                    approximate=approximate_gelu)                    # (h2, S)

    # final layer, no bias
    o_ref[...] = jnp.dot(w3_ref[...], h.astype(jnp.bfloat16),
                         preferred_element_type=jnp.float32).astype(o_ref.dtype)


def _choose_tile(S, B, tile_s):
    # Lane-dense spatial tile: multiple of 128, no bigger than the (padded)
    # spatial extent, and small enough that the grid keeps >=4 total steps so
    # v7x's two TensorCores each see >=2 parallel steps.
    tile_s = max(128, min(int(tile_s), _round_up(S, 128)))
    tile_s = _round_up(tile_s, 128)
    while B * _cdiv(S, tile_s) < 4 and tile_s > 128:
        tile_s = max(128, _round_up(_cdiv(tile_s, 2), 128))
    return tile_s


def _voxel_mlp(x3, w1, b1, w2, b2, w3, *, tile_s=8192, epilogue_dtype=None,
               approximate_gelu=True):
    """x3: (B, C_in, S) f32; weights (out, in) bf16; biases (out, 1) f32."""
    B, c_in, S = x3.shape
    h1 = w1.shape[0]
    h2 = w2.shape[0]
    c_out = w3.shape[0]

    if epilogue_dtype is None:
        epilogue_dtype = _epilogue_dtype_for_device()

    tile_s = _choose_tile(S, B, tile_s)
    grid = (B, pl.cdiv(S, tile_s))                # masked tail block if ragged

    # Pre-broadcast biases to full lane width -> plain elementwise VALU add in
    # the kernel (no per-layer (h,1)->(h,tile_s) lane splat).  Fetched once
    # (constant index map) and VMEM-resident for the whole grid.
    b1_t = jnp.broadcast_to(b1.reshape(h1, 1), (h1, tile_s)).astype(epilogue_dtype)
    b2_t = jnp.broadcast_to(b2.reshape(h2, 1), (h2, tile_s)).astype(epilogue_dtype)

    def _const(shape):
        # Full-array block, constant index -> fetched once, resident in VMEM.
        return pl.BlockSpec(shape, lambda b, s: (0, 0))

    # Advisory cost hint for XLA scheduling around the custom call.
    flops = 2 * B * S * (c_in * h1 + h1 * h2 + h2 * c_out)
    transcendentals = B * S * (h1 + h2)
    bytes_accessed = B * S * (c_in + c_out) * 4 + 2 * (
        w1.size + w2.size + w3.size) + b1_t.size * b1_t.dtype.itemsize \
        + b2_t.size * b2_t.dtype.itemsize

    kernel = functools.partial(_voxel_mlp_kernel,
                               approximate_gelu=approximate_gelu)

    return pl.pallas_call(
        kernel,
        out_shape=jax.ShapeDtypeStruct((B, c_out, S), jnp.float32),
        grid_spec=pl.GridSpec(
            grid=grid,
            in_specs=[
                # batch dim squeezed; channels full; spatial tiled on lanes
                pl.BlockSpec((None, c_in, tile_s), lambda b, s: (b, 0, s)),
                _const((h1, c_in)),
                _const((h1, tile_s)),
                _const((h2, h1)),
                _const((h2, tile_s)),
                _const((c_out, h2)),
            ],
            out_specs=pl.BlockSpec((None, c_out, tile_s), lambda b, s: (b, 0, s)),
        ),
        compiler_params=pltpu.CompilerParams(
            # Both axes embarrassingly parallel -> Mosaic can shard voxel tiles
            # across v7x's two TensorCores.
            dimension_semantics=("parallel", "parallel")),
        cost_estimate=pl.CostEstimate(flops=flops,
                                      transcendentals=transcendentals,
                                      bytes_accessed=bytes_accessed),
    )(x3, w1, b1_t, w2, b2_t, w3)


# -----------------------------------------------------------------------------
# Module wrapper (parameter init + layout glue)
# -----------------------------------------------------------------------------
class SmallerVoxelUpdateNetPallas:
    def __init__(self, num_channels=16, channel_dims=(64, 64), normal_std=0.02,
                 zero_bias=True, embedding_dim=None, key=None, tile_s=8192,
                 approximate_gelu=True):
        # TODO(synk): generalize fused kernel to arbitrary len(channel_dims);
        # current kernel is specialized to the default two hidden layers.
        assert len(channel_dims) == 2, "fused kernel supports two hidden layers"
        self.num_channels = num_channels
        self.embedding_dim = embedding_dim
        self.tile_s = tile_s
        self.approximate_gelu = approximate_gelu
        c_in = num_channels * 3 + (embedding_dim if embedding_dim else 0)
        dims = [c_in] + list(channel_dims)

        if key is None:
            key = jax.random.PRNGKey(0)
        keys = jax.random.split(key, 5)

        # Conv3d(kernel_size=1) weight (out, in, 1, 1, 1) ~ N(0, std); bias zeros.
        # Master params in f32 (for the reference); kernel copies in bf16.
        self.w1 = normal_std * jax.random.normal(keys[0], (dims[1], dims[0]), jnp.float32)
        self.b1 = (jnp.zeros((dims[1], 1), jnp.float32) if zero_bias else
                   normal_std * jax.random.normal(keys[3], (dims[1], 1), jnp.float32))
        self.w2 = normal_std * jax.random.normal(keys[1], (dims[2], dims[1]), jnp.float32)
        self.b2 = (jnp.zeros((dims[2], 1), jnp.float32) if zero_bias else
                   normal_std * jax.random.normal(keys[4], (dims[2], 1), jnp.float32))
        self.w3 = normal_std * jax.random.normal(keys[2], (num_channels, dims[2]), jnp.float32)

        # bf16 operands for the MXU (f32 accumulation inside the kernel).
        self.w1_k = self.w1.astype(jnp.bfloat16)
        self.w2_k = self.w2.astype(jnp.bfloat16)
        self.w3_k = self.w3.astype(jnp.bfloat16)

    def __call__(self, x, embeddings=None):
        # x: (B, C, D, H, W) (PyTorch NCDHW convention)
        if embeddings is not None:
            x = jnp.concatenate((x, embeddings), axis=1)
        B, C, D, H, W = x.shape
        x3 = x.reshape(B, C, D * H * W)        # free view: no HBM transpose
        out3 = _voxel_mlp(x3, self.w1_k, self.b1, self.w2_k, self.b2, self.w3_k,
                          tile_s=self.tile_s,
                          approximate_gelu=self.approximate_gelu)
        return out3.reshape(B, self.num_channels, D, H, W)


# -----------------------------------------------------------------------------
# Pure-JAX f32 reference (exact-erf GELU, matching torch.nn.GELU()) for sanity
# -----------------------------------------------------------------------------
def _reference(model, x):
    B, C, D, H, W = x.shape
    x3 = x.reshape(B, C, -1)
    h = jax.nn.gelu(jnp.einsum('oc,bcs->bos', model.w1, x3) + model.b1[None],
                    approximate=False)
    h = jax.nn.gelu(jnp.einsum('oc,bcs->bos', model.w2, h) + model.b2[None],
                    approximate=False)
    o = jnp.einsum('oc,bcs->bos', model.w3, h)
    return o.reshape(B, model.num_channels, D, H, W)


if __name__ == "__main__":
    # Small config: num_channels=4 -> conv input channels = 12, hidden dims = 32.
    num_channels = 4
    channel_dims = (32, 32)
    B, D, H, W = 2, 16, 16, 16             # 4096 voxels per batch element

    key = jax.random.PRNGKey(0)
    k_x, k_p = jax.random.split(key)
    x = jax.random.normal(k_x, (B, num_channels * 3, D, H, W), jnp.float32)

    model = SmallerVoxelUpdateNetPallas(
        num_channels=num_channels, channel_dims=channel_dims,
        normal_std=0.02, zero_bias=True, embedding_dim=None, key=k_p,
        tile_s=8192)

    y = jax.block_until_ready(model(x))
    y_ref = jax.block_until_ready(_reference(model, x))

    assert y.shape == (B, num_channels, D, H, W)
    # bf16 operands + tanh GELU -> validate with a normalized tolerance vs the
    # exact-erf f32 reference.
    err = float(jnp.max(jnp.abs(y - y_ref)))
    scale = float(jnp.max(jnp.abs(y_ref)))
    assert err <= 5e-2 * max(scale, 1e-12), (err, scale)

    print("KERNEL_OK")
</pallas_src>

<mosaic_0001>
module attributes {stable_mosaic.version = 11 : i64} {
  func.func @_voxel_mlp_kernel(%arg0: i32, %arg1: i32, %arg2: memref<1x12x2048xf32, #tpu.memory_space<vmem>>, %arg3: memref<32x12xbf16, #tpu.memory_space<vmem>>, %arg4: memref<32x2048xbf16, #tpu.memory_space<vmem>>, %arg5: memref<32x32xbf16, #tpu.memory_space<vmem>>, %arg6: memref<32x2048xbf16, #tpu.memory_space<vmem>>, %arg7: memref<4x32xbf16, #tpu.memory_space<vmem>>, %arg8: memref<1x4x2048xf32, #tpu.memory_space<vmem>>) attributes {dimension_semantics = [#tpu.dimension_semantics<parallel>, #tpu.dimension_semantics<parallel>], iteration_bounds = array<i64: 2, 2>, scalar_prefetch = 0 : i64, scratch_operands = 0 : i64, tpu.core_type = #tpu.core_type<tc>, window_params = [{transform_indices = @transform_0, window_bounds = array<i64: 1, 12, 2048>}, {pipeline_mode = #tpu.pipeline_mode<synchronous>, transform_indices = @transform_1, window_bounds = array<i64: 32, 12>}, {pipeline_mode = #tpu.pipeline_mode<synchronous>, transform_indices = @transform_2, window_bounds = array<i64: 32, 2048>}, {pipeline_mode = #tpu.pipeline_mode<synchronous>, transform_indices = @transform_3, window_bounds = array<i64: 32, 32>}, {pipeline_mode = #tpu.pipeline_mode<synchronous>, transform_indices = @transform_4, window_bounds = array<i64: 32, 2048>}, {pipeline_mode = #tpu.pipeline_mode<synchronous>, transform_indices = @transform_5, window_bounds = array<i64: 4, 32>}, {transform_indices = @transform_6, window_bounds = array<i64: 1, 4, 2048>}]} {
    %c0 = arith.constant 0 : index
    %c0_0 = arith.constant 0 : index
    %c0_1 = arith.constant 0 : index
    %0 = vector.load %arg2[%c0, %c0_0, %c0_1] : memref<1x12x2048xf32, #tpu.memory_space<vmem>>, vector<1x12x2048xf32>
    %1 = vector.shape_cast %0 : vector<1x12x2048xf32> to vector<12x2048xf32>
    %2 = arith.truncf %1 : vector<12x2048xf32> to vector<12x2048xbf16>
    %c0_2 = arith.constant 0 : index
    %c0_3 = arith.constant 0 : index
    %3 = vector.load %arg3[%c0_2, %c0_3] : memref<32x12xbf16, #tpu.memory_space<vmem>>, vector<32x12xbf16>
    %cst = arith.constant dense<0.000000e+00> : vector<32x2048xf32>
    %4 = tpu.matmul %3, %2, %cst {dimension_numbers = #tpu.dot_dimension_numbers<[1], [0], [0], [1], [0, 0, 1, 1], [], []>} : vector<32x12xbf16>, vector<12x2048xbf16>, vector<32x2048xf32> -> vector<32x2048xf32>
    %5 = arith.truncf %4 : vector<32x2048xf32> to vector<32x2048xbf16>
    %c0_4 = arith.constant 0 : index
    %c0_5 = arith.constant 0 : index
    %6 = vector.load %arg4[%c0_4, %c0_5] : memref<32x2048xbf16, #tpu.memory_space<vmem>>, vector<32x2048xbf16>
    %7 = arith.addf %5, %6 : vector<32x2048xbf16>
    %8 = arith.mulf %7, %7 : vector<32x2048xbf16>
    %9 = arith.mulf %7, %8 : vector<32x2048xbf16>
    %cst_6 = arith.constant 4.467770e-02 : bf16
    %10 = vector.broadcast %cst_6 : bf16 to vector<32x2048xbf16>
    %11 = arith.mulf %10, %9 : vector<32x2048xbf16>
    %12 = arith.addf %7, %11 : vector<32x2048xbf16>
    %cst_7 = arith.constant 7.968750e-01 : bf16
    %13 = vector.broadcast %cst_7 : bf16 to vector<32x2048xbf16>
    %14 = arith.mulf %13, %12 : vector<32x2048xbf16>
    %15 = math.tanh %14 : vector<32x2048xbf16>
    %cst_8 = arith.constant 1.000000e+00 : bf16
    %16 = vector.broadcast %cst_8 : bf16 to vector<32x2048xbf16>
    %17 = arith.addf %16, %15 : vector<32x2048xbf16>
    %cst_9 = arith.constant 5.000000e-01 : bf16
    %18 = vector.broadcast %cst_9 : bf16 to vector<32x2048xbf16>
    %19 = arith.mulf %18, %17 : vector<32x2048xbf16>
    %20 = arith.mulf %7, %19 : vector<32x2048xbf16>
    %c0_10 = arith.constant 0 : index
    %c0_11 = arith.constant 0 : index
    %21 = vector.load %arg5[%c0_10, %c0_11] : memref<32x32xbf16, #tpu.memory_space<vmem>>, vector<32x32xbf16>
    %cst_12 = arith.constant dense<0.000000e+00> : vector<32x2048xf32>
    %22 = tpu.matmul %21, %20, %cst_12 {dimension_numbers = #tpu.dot_dimension_numbers<[1], [0], [0], [1], [0, 0, 1, 1], [], []>} : vector<32x32xbf16>, vector<32x2048xbf16>, vector<32x2048xf32> -> vector<32x2048xf32>
    %23 = arith.truncf %22 : vector<32x2048xf32> to vector<32x2048xbf16>
    %c0_13 = arith.constant 0 : index
    %c0_14 = arith.constant 0 : index
    %24 = vector.load %arg6[%c0_13, %c0_14] : memref<32x2048xbf16, #tpu.memory_space<vmem>>, vector<32x2048xbf16>
    %25 = arith.addf %23, %24 : vector<32x2048xbf16>
    %26 = arith.mulf %25, %25 : vector<32x2048xbf16>
    %27 = arith.mulf %25, %26 : vector<32x2048xbf16>
    %cst_15 = arith.constant 4.467770e-02 : bf16
    %28 = vector.broadcast %cst_15 : bf16 to vector<32x2048xbf16>
    %29 = arith.mulf %28, %27 : vector<32x2048xbf16>
    %30 = arith.addf %25, %29 : vector<32x2048xbf16>
    %cst_16 = arith.constant 7.968750e-01 : bf16
    %31 = vector.broadcast %cst_16 : bf16 to vector<32x2048xbf16>
    %32 = arith.mulf %31, %30 : vector<32x2048xbf16>
    %33 = math.tanh %32 : vector<32x2048xbf16>
    %cst_17 = arith.constant 1.000000e+00 : bf16
    %34 = vector.broadcast %cst_17 : bf16 to vector<32x2048xbf16>
    %35 = arith.addf %34, %33 : vector<32x2048xbf16>
    %cst_18 = arith.constant 5.000000e-01 : bf16
    %36 = vector.broadcast %cst_18 : bf16 to vector<32x2048xbf16>
    %37 = arith.mulf %36, %35 : vector<32x2048xbf16>
    %38 = arith.mulf %25, %37 : vector<32x2048xbf16>
    %c0_19 = arith.constant 0 : index
    %c0_20 = arith.constant 0 : index
    %39 = vector.load %arg7[%c0_19, %c0_20] : memref<4x32xbf16, #tpu.memory_space<vmem>>, vector<4x32xbf16>
    %cst_21 = arith.constant dense<0.000000e+00> : vector<4x2048xf32>
    %40 = tpu.matmul %39, %38, %cst_21 {dimension_numbers = #tpu.dot_dimension_numbers<[1], [0], [0], [1], [0, 0, 1, 1], [], []>} : vector<4x32xbf16>, vector<32x2048xbf16>, vector<4x2048xf32> -> vector<4x2048xf32>
    %c0_22 = arith.constant 0 : index
    %c0_23 = arith.constant 0 : index
    %c0_24 = arith.constant 0 : index
    %41 = vector.load %arg8[%c0_22, %c0_23, %c0_24] : memref<1x4x2048xf32, #tpu.memory_space<vmem>>, vector<1x4x2048xf32>
    %42 = vector.shape_cast %41 : vector<1x4x2048xf32> to vector<4x2048xf32>
    %43 = vector.shape_cast %40 : vector<4x2048xf32> to vector<1x4x2048xf32>
    tpu.vector_store %arg8[%c0_22, %c0_23, %c0_24], %43 {strides = array<i32>} : memref<1x4x2048xf32, #tpu.memory_space<vmem>>, vector<1x4x2048xf32>,
    return
  }
  func.func @transform_0(%arg0: i32, %arg1: i32) -> (i32, i32, i32) {
    %c0_i32 = arith.constant 0 : i32
    %c0_i32_0 = arith.constant 0 : i32
    return %arg0, %c0_i32, %arg1 : i32, i32, i32
  }
  func.func @transform_1(%arg0: i32, %arg1: i32) -> (i32, i32) {
    %c0_i32 = arith.constant 0 : i32
    %c0_i32_0 = arith.constant 0 : i32
    %c0_i32_1 = arith.constant 0 : i32
    return %c0_i32, %c0_i32_0 : i32, i32
  }
  func.func @transform_2(%arg0: i32, %arg1: i32) -> (i32, i32) {
    %c0_i32 = arith.constant 0 : i32
    %c0_i32_0 = arith.constant 0 : i32
    %c0_i32_1 = arith.constant 0 : i32
    return %c0_i32, %c0_i32_0 : i32, i32
  }
  func.func @transform_3(%arg0: i32, %arg1: i32) -> (i32, i32) {
    %c0_i32 = arith.constant 0 : i32
    %c0_i32_0 = arith.constant 0 : i32
    %c0_i32_1 = arith.constant 0 : i32
    return %c0_i32, %c0_i32_0 : i32, i32
  }
  func.func @transform_4(%arg0: i32, %arg1: i32) -> (i32, i32) {
    %c0_i32 = arith.constant 0 : i32
    %c0_i32_0 = arith.constant 0 : i32
    %c0_i32_1 = arith.constant 0 : i32
    return %c0_i32, %c0_i32_0 : i32, i32
  }
  func.func @transform_5(%arg0: i32, %arg1: i32) -> (i32, i32) {
    %c0_i32 = arith.constant 0 : i32
    %c0_i32_0 = arith.constant 0 : i32
    %c0_i32_1 = arith.constant 0 : i32
    return %c0_i32, %c0_i32_0 : i32, i32
  }
  func.func @transform_6(%arg0: i32, %arg1: i32) -> (i32, i32, i32) {
    %c0_i32 = arith.constant 0 : i32
    %c0_i32_0 = arith.constant 0 : i32
    return %arg0, %c0_i32, %arg1 : i32, i32, i32
  }
}

</mosaic_0001>

<bundles_post_ra>
// kernel: tpu_custom_call.1
= control target key start
LH: loop header
LB: loop body
LE: loop exit
PB: predicated region body
PF: predicated region fallthrough
CT: control target
= control target key end

     0   :  { %11 = vsyncpa [#allocation4], 0  ;;  %s4895_s0 = inlined_call_operand.vmem [shape: f32[2,12,4096], index: 0, kind: input, shape index: {}]   ;;  %s4896_s1 = inlined_call_operand.vmem [shape: bf16[32,12], index: 1, kind: input, shape index: {}]   ;;  %s4897_s2 = inlined_call_operand.vmem [shape: bf16[32,2048], index: 2, kind: input, shape index: {}]   ;;  %s4898_s3 = inlined_call_operand.vmem [shape: bf16[32,32], index: 3, kind: input, shape index: {}]   ;;  %s4899_s4 = inlined_call_operand.vmem [shape: bf16[32,2048], index: 4, kind: input, shape index: {}]   ;;  %s4900_s5 = inlined_call_operand.vmem [shape: bf16[4,32], index: 5, kind: input, shape index: {}]   ;;  %s4901_s6 = inlined_call_operand.hbm [shape: f32[2,4,4096], index: 6, kind: output, shape index: {}]  }
   0x1   :  { %13 = vsyncpa [#allocation4 + $0x1], 0  ;;  %s3371_s21 = smov 0   ;;  %s3373_s22 = smov 0  }
   0x2   :  { %s3375_s23 = smov 0   ;;  %s3377_s24 = smov 0  }
   0x3   :  { %s3379_s25 = smov 0   ;;  %s3381_s26 = smov 0  }
   0x4   :  { %s3383_s27 = smov 0   ;;  %s3385_s28 = smov 0  }
   0x5 LB: > { %s2903_s29 = sadd.s32 4294967295, %s3332_s28   ;;  %s2904_s30 = sadd.s32 4294967294, %s3332_s28   ;;  %s3332_s28 = sphi %s3385_s28, %s19_s28   ;;  %s3328_s27 = sphi %s3383_s27, %s4968_s27   ;;  %s3324_s26 = sphi %s3381_s26, %s4967_s26   ;;  %s3320_s25 = sphi %s3379_s25, %s4966_s25   ;;  %s3316_s24 = sphi %s3377_s24, %s4965_s24   ;;  %s3312_s23 = sphi %s3375_s23, %s4964_s23   ;;  %s3308_s22 = sphi %s3373_s22, %s4963_s22   ;;  %s3304_s21 = sphi %s3371_s21, %s4962_s21  }
   0x6   : > { %s28_s7 = sadd.s32 1, %s3324_s26  ;;  %s31_s8 = sadd.s32 1, %s3328_s27 }
   0x7   : > { %p29_p0 = scmp.ge.s32.totalorder %s28_s7, 2  ;;  %p47_p1 = scmp.ne.s32.totalorder %s3312_s23, %s3308_s22 }
   0x8   : > { %p48_p2 = scmp.eq.s32.totalorder %s3332_s28, 0  ;;  %p184_p5 = scmp.eq.s32.totalorder %s2903_s29, 3 }
   0x9   : > { %s4970_s7 = smov (%p29_p0, %s28_s7), 0  ;;  %s4972_s8 = smov (!%p29_p0, %s31_s8), %s3328_s27 }
   0xa   : > { %s36_s9 = ssub.s32 %s3324_s26, %s4970_s7  ;;  %p3423_p3 = por %p48_p2, %p47_p1 }
   0xb   : > { %p33_p4 = scmp.ge.s32.totalorder %s4972_s8, 2  ;;  %p189_p6 = scmp.ne.s32.totalorder %s3308_s22, %s3304_s21 }
   0xc   : > { %p190_p7 = scmp.eq.s32.totalorder %s2904_s30, 3  ;;  %p3431_p8 = por %p184_p5, %p47_p1 }
   0xd   : > { %s4974_s8 = smov (%p33_p4, %s4972_s8), 0  ;;  %s40_s15 = sadd.s32 1, %s3312_s23 }
   0xe   : > { %p3435_p9 = por %p190_p7, %p189_p6  ;;  %s35_s13 = ssub.s32 %s3328_s27, %s4974_s8 }
   0xf   : > { %s37_s14 = sor.u32 %s36_s9, %s35_s13  ;;  %p2906_p11 = scmp.ge.s32.totalorder %s3332_s28, 4 }
  0x10   : > { %p38_p10 = scmp.eq.s32.totalorder %s37_s14, 0 }
  0x11   : > { %221 = sbr.rel (%p2906_p11) target bundleno = 45 (0x2d), region = 36 }
  0x12   : > { %s3443_s16 = scalar_select %p38_p10, %s3312_s23, %s40_s15  }
  0x16   : > { %224 = sbr.rel (!%p3423_p3) target bundleno = 45 (0x2d), region = 40  ;;  %s226_s17 = sand.u32 (%p3423_p3), 1, %s3312_s23  }
  0x17   : > { %s2908_s18 = sshll.u32 (%p3423_p3), %s3324_s26, 4  ;;  %s2907_s19 = sshll.u32 (%p3423_p3), %s226_s17, 8 }
  0x18   : > { %s2909_s20 = sshll.u32 (%p3423_p3), %s3328_s27, 6  ;;  %s3459_s10 = scalar_lea.vmem (%p3423_p3), [#allocation2], %s2907_s19 }
  0x19   : > { %s231_s29 = sadd.s32 (%p3423_p3), %s2909_s20, %s2908_s18 }
  0x1a   : > { %s2910_s30 = sshll.u32 (%p3423_p3), %s231_s29, 3 }
  0x1b   : > { %s3454_s14 = scalar_lea.vmem %s4895_s0, %s2910_s30 }
  0x1c   : > { %v246_v0 = vld [vmem:[%s3454_s14] sm:$0xff]  ;;  %v248_v1 = vld [vmem:[%s3454_s14 + $0x8] sm:$0xff]  ;;  %v250_v2 = vld [vmem:[%s3454_s14 + $0x10] sm:$0xff] }
  0x1d   : > { %247 = vst [vmem:[%s3459_s10] sm:$0xff] %v246_v0  ;;  %249 = vst [vmem:[%s3459_s10 + $0x8] sm:$0xff] %v248_v1  ;;  %v252_v3 = vld [vmem:[%s3454_s14 + $0x18] sm:$0xff]  ;;  %v254_v4 = vld [vmem:[%s3454_s14 + $0x20] sm:$0xff] }
  0x1e   : > { %251 = vst [vmem:[%s3459_s10 + $0x10] sm:$0xff] %v250_v2  ;;  %v256_v5 = vld [vmem:[%s3454_s14 + $0x28] sm:$0xff]  ;;  %253 = vst [vmem:[%s3459_s10 + $0x18] sm:$0xff] %v252_v3  ;;  %v258_v6 = vld [vmem:[%s3454_s14 + $0x30] sm:$0xff] }
  0x1f   : > { %255 = vst [vmem:[%s3459_s10 + $0x20] sm:$0xff] %v254_v4  ;;  %257 = vst [vmem:[%s3459_s10 + $0x28] sm:$0xff] %v256_v5  ;;  %v260_v7 = vld [vmem:[%s3454_s14 + $0x38] sm:$0xff]  ;;  %v262_v8 = vld [vmem:[%s3454_s14 + $0x40] sm:$0xff] }
  0x20   : > { %259 = vst [vmem:[%s3459_s10 + $0x30] sm:$0xff] %v258_v6  ;;  %261 = vst [vmem:[%s3459_s10 + $0x38] sm:$0xff] %v260_v7  ;;  %v264_v9 = vld [vmem:[%s3454_s14 + $0x48] sm:$0xff]  ;;  %v266_v10 = vld [vmem:[%s3454_s14 + $0x50] sm:$0xff] }
  0x21   : > { %263 = vst [vmem:[%s3459_s10 + $0x40] sm:$0xff] %v262_v8  ;;  %v268_v11 = vld [vmem:[%s3454_s14 + $0x58] sm:$0xff]  ;;  %265 = vst [vmem:[%s3459_s10 + $0x48] sm:$0xff] %v264_v9  ;;  %v270_v12 = vld [vmem:[%s3454_s14 + $0x60] sm:$0xff] }
  0x22   : > { %267 = vst [vmem:[%s3459_s10 + $0x50] sm:$0xff] %v266_v10  ;;  %269 = vst [vmem:[%s3459_s10 + $0x58] sm:$0xff] %v268_v11  ;;  %v272_v13 = vld [vmem:[%s3454_s14 + $0x68] sm:$0xff]  ;;  %v274_v14 = vld [vmem:[%s3454_s14 + $0x70] sm:$0xff] }
  0x23   : > { %271 = vst [vmem:[%s3459_s10 + $0x60] sm:$0xff] %v270_v12  ;;  %273 = vst [vmem:[%s3459_s10 + $0x68] sm:$0xff] %v272_v13  ;;  %v276_v15 = vld [vmem:[%s3454_s14 + $0x78] sm:$0xff]  ;;  %v278_v16 = vld [vmem:[%s3454_s14 + $0x100] sm:$0xff] }
  0x24   : > { %275 = vst [vmem:[%s3459_s10 + $0x70] sm:$0xff] %v274_v14  ;;  %v280_v17 = vld [vmem:[%s3454_s14 + $0x108] sm:$0xff]  ;;  %277 = vst [vmem:[%s3459_s10 + $0x78] sm:$0xff] %v276_v15  ;;  %v282_v18 = vld [vmem:[%s3454_s14 + $0x110] sm:$0xff] }
  0x25   : > { %279 = vst [vmem:[%s3459_s10 + $0x80] sm:$0xff] %v278_v16  ;;  %281 = vst [vmem:[%s3459_s10 + $0x88] sm:$0xff] %v280_v17  ;;  %v284_v19 = vld [vmem:[%s3454_s14 + $0x118] sm:$0xff]  ;;  %v286_v20 = vld [vmem:[%s3454_s14 + $0x120] sm:$0xff] }
  0x26   : > { %283 = vst [vmem:[%s3459_s10 + $0x90] sm:$0xff] %v282_v18  ;;  %285 = vst [vmem:[%s3459_s10 + $0x98] sm:$0xff] %v284_v19  ;;  %v288_v21 = vld [vmem:[%s3454_s14 + $0x128] sm:$0xff]  ;;  %v290_v22 = vld [vmem:[%s3454_s14 + $0x130] sm:$0xff] }
  0x27   : > { %287 = vst [vmem:[%s3459_s10 + $0xa0] sm:$0xff] %v286_v20  ;;  %v292_v23 = vld [vmem:[%s3454_s14 + $0x138] sm:$0xff]  ;;  %289 = vst [vmem:[%s3459_s10 + $0xa8] sm:$0xff] %v288_v21  ;;  %v294_v24 = vld [vmem:[%s3454_s14 + $0x140] sm:$0xff] }
  0x28   : > { %291 = vst [vmem:[%s3459_s10 + $0xb0] sm:$0xff] %v290_v22  ;;  %293 = vst [vmem:[%s3459_s10 + $0xb8] sm:$0xff] %v292_v23  ;;  %v296_v25 = vld [vmem:[%s3454_s14 + $0x148] sm:$0xff]  ;;  %v298_v26 = vld [vmem:[%s3454_s14 + $0x150] sm:$0xff] }
  0x29   : > { %295 = vst [vmem:[%s3459_s10 + $0xc0] sm:$0xff] %v294_v24  ;;  %297 = vst [vmem:[%s3459_s10 + $0xc8] sm:$0xff] %v296_v25  ;;  %v300_v27 = vld [vmem:[%s3454_s14 + $0x158] sm:$0xff]  ;;  %v302_v28 = vld [vmem:[%s3454_s14 + $0x160] sm:$0xff] }
  0x2a   : > { %299 = vst [vmem:[%s3459_s10 + $0xd0] sm:$0xff] %v298_v26  ;;  %v304_v29 = vld [vmem:[%s3454_s14 + $0x168] sm:$0xff]  ;;  %301 = vst [vmem:[%s3459_s10 + $0xd8] sm:$0xff] %v300_v27  ;;  %v306_v30 = vld [vmem:[%s3454_s14 + $0x170] sm:$0xff] }
  0x2b   : > { %303 = vst [vmem:[%s3459_s10 + $0xe0] sm:$0xff] %v302_v28  ;;  %305 = vst [vmem:[%s3459_s10 + $0xe8] sm:$0xff] %v304_v29  ;;  %v308_v31 = vld [vmem:[%s3454_s14 + $0x178] sm:$0xff] }
  0x2c   : > { %307 = vst [vmem:[%s3459_s10 + $0xf0] sm:$0xff] %v306_v30  ;;  %309 = vst [vmem:[%s3459_s10 + $0xf8] sm:$0xff] %v308_v31 }
  0x2d PF: > { %p2911_p12 = scmp.ge.s32.totalorder %s3332_s28, 1  ;;  %p314_p13 = scmp.lt.s32.totalorder %s3332_s28, 5 }
  0x2f   : > { %p315_p0 = pnand %p2911_p12, %p314_p13 }
  0x31   : > { %318 = sbr.rel (%p315_p0) target bundleno = 869 (0x365), region = 63 }
  0x36   : > { %s3525_s15 = sand.u32 1, %s3308_s22   ;;  %v4902_v32 = vmov 0   ;;  %vm426_vm0 = vcmask 1045504   ;;  %v3543_v44 = vld [vmem:[%s4896_s1] sm:$0xff]   ;;  %vm419_vm1 = vcmask 97280   ;;  %v3109_v4 = vld [vmem:[%s4896_s1 + $0x8] sm:$0xff]  }
  0x37   : > { %s2912_s17 = sshll.u32 %s3525_s15, 8  ;;  %507 = vmatprep.mubr.bf16.mxu0 %v4902_v32  ;;  %560 = vmatprep.mubr.bf16.mxu1 %v4902_v32  ;;  %v931_v28 = vld [vmem:[%s4897_s2] sm:$0xff]  ;;  %vm1457_vm2 = vcmask 261120   ;;  %s3031_s19 = sshll.u32 %s3316_s24, 4 }
  0x38   : > { %s3530_s18 = scalar_lea.vmem [#allocation2], %s2912_s17  ;;  %v939_v29 = vld [vmem:[%s4897_s2 + $0x40] sm:$0xff]  ;;  %s2913_s17 = sshll.u32 %s3525_s15, 6 }
  0x39   : > { %v358_v33 = vld [vmem:[%s3530_s18 + $0x8] sm:$0xff]  ;;  %v360_v35 = vld [vmem:[%s3530_s18 + $0x18] sm:$0xff]  ;;  %v357_v38 = vld [vmem:[%s3530_s18] sm:$0xff]  ;;  %s3032_s20 = sshll.u32 %s3320_s25, 5  ;;  %s2805_s14 = scalar_lea.sflag [#allocation4], %s3525_s15 }
  0x3a   : > { %v374_v34 = vld [vmem:[%s3530_s18 + $0x88] sm:$0xf]  ;;  %v376_v37 = vld [vmem:[%s3530_s18 + $0x98] sm:$0xf]  ;;  %v373_v39 = vld [vmem:[%s3530_s18 + $0x80] sm:$0xf]  ;;  %s2817_s29 = sadd.s32 %s3032_s20, %s3031_s19 }
  0x3b   : > { %v390_v36 = vpack.c.bf16 %v374_v34, %v358_v33  ;;  %v392_v40 = vpack.c.bf16 %v376_v37, %v360_v35  ;;  %v389_v41 = vpack.c.bf16 %v373_v39, %v357_v38  ;;  %v359_v42 = vld [vmem:[%s3530_s18 + $0x10] sm:$0xff]  ;;  %v362_v45 = vld [vmem:[%s3530_s18 + $0x28] sm:$0xff]  ;;  %v364_v48 = vld [vmem:[%s3530_s18 + $0x38] sm:$0xff]  ;;  %v2940_v34 = vcombine.low %v931_v28, %v939_v29  ;;  %s3033_s30 = sshll.u32 %s2817_s29, 6 }
  0x3c   : > { %v375_v43 = vld [vmem:[%s3530_s18 + $0x90] sm:$0xf]  ;;  %v378_v47 = vld [vmem:[%s3530_s18 + $0xa8] sm:$0xf]  ;;  %v380_v49 = vld [vmem:[%s3530_s18 + $0xb8] sm:$0xf]  ;;  %s4840_s13 = scalar_lea.hbm %s4901_s6, %s3033_s30 }
  0x3d   : > { %2916 = vmatprep.subr.msk.bf16.mxu0 %vm426_vm0, %v390_v36  ;;  %v391_v46 = vpack.c.bf16 %v375_v43, %v359_v42  ;;  %2919 = vmatprep.subr.msk.bf16.mxu1 %vm426_vm0, %v392_v40  ;;  %v428_v50 = vsel %vm426_vm0, %v389_v41, 0  ;;  %v394_v51 = vpack.c.bf16 %v378_v47, %v362_v45  ;;  %v396_v52 = vpack.c.bf16 %v380_v49, %v364_v48  ;;  %v361_v53 = vld [vmem:[%s3530_s18 + $0x20] sm:$0xff]  ;;  %v363_v55 = vld [vmem:[%s3530_s18 + $0x30] sm:$0xff]  ;;  %v366_v59 = vld [vmem:[%s3530_s18 + $0x48] sm:$0xff] }
  0x3e   : > { %v377_v54 = vld [vmem:[%s3530_s18 + $0xa0] sm:$0xf]  ;;  %490 = vmatpush1.bf16.msra.mxu0 %v428_v50  ;;  %v379_v58 = vld [vmem:[%s3530_s18 + $0xb0] sm:$0xf]  ;;  %v382_v60 = vld [vmem:[%s3530_s18 + $0xc8] sm:$0xf]  ;;  %v2941_v40 = vcombine.high %v931_v28, %v939_v29 }
  0x3f   : > { %v434_v56 = vsel %vm426_vm0, %v391_v46, 0  ;;  %v393_v57 = vpack.c.bf16 %v377_v54, %v361_v53  ;;  %2922 = vmatprep.subr.msk.bf16.mxu0 %vm426_vm0, %v394_v51  ;;  %v395_v61 = vpack.c.bf16 %v379_v58, %v363_v55  ;;  %v368_v62 = vld [vmem:[%s3530_s18 + $0x58] sm:$0xff]  ;;  %v398_v1 = vpack.c.bf16 %v382_v60, %v366_v59  ;;  %v365_v5 = vld [vmem:[%s3530_s18 + $0x40] sm:$0xff]  ;;  %v367_v7 = vld [vmem:[%s3530_s18 + $0x50] sm:$0xff] }
  0x40   : > { %543 = vmatpush1.bf16.msra.mxu1 %v434_v56  ;;  %v384_v63 = vld [vmem:[%s3530_s18 + $0xd8] sm:$0xf]  ;;  %v381_v6 = vld [vmem:[%s3530_s18 + $0xc0] sm:$0xf]  ;;  %v383_v8 = vld [vmem:[%s3530_s18 + $0xd0] sm:$0xf] }
  0x41   : > { %2925 = vmatprep.subr.msk.bf16.mxu1 %vm426_vm0, %v396_v52  ;;  %v440_v0 = vsel %vm426_vm0, %v393_v57, 0  ;;  %2917 = vmatmul.mubr.msk.bf16.vlgmr.msra.gmra.mxu0 %vm419_vm1, %v3543_v44  ;;  %v446_v2 = vsel %vm426_vm0, %v395_v61, 0  ;;  %v400_v3 = vpack.c.bf16 %v384_v63, %v368_v62  ;;  %v397_v9 = vpack.c.bf16 %v381_v6, %v365_v5  ;;  %v370_v11 = vld [vmem:[%s3530_s18 + $0x68] sm:$0xff]  ;;  %v372_v13 = vld [vmem:[%s3530_s18 + $0x78] sm:$0xff]  ;;  %v369_v19 = vld [vmem:[%s3530_s18 + $0x60] sm:$0xff] }
  0x42   : > { %517 = vmatprep.mubr.bf16.mxu0 %v4902_v32  ;;  %596 = vmatpush1.bf16.msra.mxu0 %v440_v0  ;;  %v399_v10 = vpack.c.bf16 %v383_v8, %v367_v7  ;;  %v386_v12 = vld [vmem:[%s3530_s18 + $0xe8] sm:$0xf]  ;;  %v388_v14 = vld [vmem:[%s3530_s18 + $0xf8] sm:$0xf]  ;;  %v385_v20 = vld [vmem:[%s3530_s18 + $0xe0] sm:$0xf] }
  0x43   : > { %2920 = vmatmul.mubr.msk.bf16.vlgmr.msra.gmra.mxu1 %vm419_vm1, %v3543_v44  ;;  %2928 = vmatprep.subr.msk.bf16.mxu0 %vm426_vm0, %v398_v1  ;;  %v452_v15 = vsel %vm426_vm0, %v397_v9, 0  ;;  %v402_v16 = vpack.c.bf16 %v386_v12, %v370_v11  ;;  %v404_v18 = vpack.c.bf16 %v388_v14, %v372_v13  ;;  %v371_v21 = vld [vmem:[%s3530_s18 + $0x70] sm:$0xff]  ;;  %v401_v23 = vpack.c.bf16 %v385_v20, %v369_v19  ;;  %v932_v38 = vld [vmem:[%s4897_s2 + $0x8] sm:$0xff]  ;;  %v947_v48 = vld [vmem:[%s4897_s2 + $0x80] sm:$0xff] }
  0x44   : > { %570 = vmatprep.mubr.bf16.mxu1 %v4902_v32  ;;  %649 = vmatpush1.bf16.msra.mxu1 %v446_v2  ;;  %v458_v17 = vsel %vm426_vm0, %v399_v10, 0  ;;  %v387_v22 = vld [vmem:[%s3530_s18 + $0xf0] sm:$0xf]  ;;  %v940_v39 = vld [vmem:[%s4897_s2 + $0x48] sm:$0xff]  ;;  %v955_v49 = vld [vmem:[%s4897_s2 + $0xc0] sm:$0xff]  ;;  %s4826_s18 = scalar_lea.vmem [#allocation3], %s2913_s17 }
  0x45   : > { %2931 = vmatprep.subr.msk.bf16.mxu1 %vm426_vm0, %v400_v3  ;;  %v403_v24 = vpack.c.bf16 %v387_v22, %v371_v21  ;;  %v464_v25 = vsel %vm426_vm0, %v401_v23, 0  ;;  %v2943_v42 = vcombine.high %v932_v38, %v940_v39  ;;  %v948_v53 = vld [vmem:[%s4897_s2 + $0x88] sm:$0xff]  ;;  %v2956_v60 = vcombine.low %v947_v48, %v955_v49  ;;  %v3670_v11 = vld [vmem:[%s4897_s2 + $0x10] sm:$0xff]  ;;  %v3686_v21 = vld [vmem:[%s4897_s2 + $0x18] sm:$0xff]  ;;  %s2821_s9 = sshll.u32 %s4826_s18, 4  ;;  %s3335_s17 = smov [#allocation3]   ;;  %s4842_s9 = int_to_ptr.vmem [resolvable:$true] %s2821_s9 }
  0x46   : > { %v956_v54 = vld [vmem:[%s4897_s2 + $0xc8] sm:$0xff]  ;;  %v2942_v62 = vcombine.low %v932_v38, %v940_v39  ;;  %v2957_v6 = vcombine.high %v947_v48, %v955_v49  ;;  %v3675_v12 = vld [vmem:[%s4897_s2 + $0x50] sm:$0xff]  ;;  %v942_v22 = vld [vmem:[%s4897_s2 + $0x58] sm:$0xff]  ;;  %s3240_s10 = scalar_lea.vmem %s4842_s9, 1024  ;;  %s3244_s19 = sshll.u32 %s3335_s17, 4  ;;  %s3245_s19 = int_to_ptr.vmem [resolvable:$false] %s3244_s19 }
  0x47   : > { %v470_v26 = vsel %vm426_vm0, %v403_v24, 0  ;;  %v2958_v1 = vcombine.low %v948_v53, %v956_v54  ;;  %v2959_v10 = vcombine.high %v948_v53, %v956_v54  ;;  %v2945_v38 = vcombine.high %v3670_v11, %v3675_v12  ;;  %p3241_p1 = scmp.ne.s32.totalorder %s4842_s9, %s3240_s10  ;;  %s3246_s20 = scalar_lea.vmem %s3245_s19, 2048 }
  0x48   : > { %p3247_p4 = scmp.lt.s32.totalorder %s4842_s9, %s3245_s19  ;;  %p3248_p5 = scmp.lt.s32.totalorder %s3246_s20, %s3240_s10 }
  0x49   : > { %2918 = vmatmul.mubr.msk.bf16.gmra.mxu0 %vm419_vm1, %v3109_v4  ;;  %p3242_p2 = pnand %p3241_p1, %p3431_p8 }
  0x4a   : > { %613 = vmatprep.mubr.bf16.mxu0 %v4902_v32  ;;  %p3249_p6 = por %p3248_p5, %p3247_p4 }
  0x4b   : > { %2921 = vmatmul.mubr.msk.bf16.gmra.mxu1 %vm419_vm1, %v3109_v4  ;;  %p3243_p3 = pneg %p3242_p2 }
  0x4c   : > { %666 = vmatprep.mubr.bf16.mxu1 %v4902_v32 }
  0x4d   : > { %p3250_p7 = pnand %p3249_p6, %p3243_p3 }
  0x51   : > { %2923 = vmatmul.mubr.msk.bf16.vlgmr.msra.gmra.mxu0 %vm419_vm1, %v3543_v44 }
  0x52   : > { %623 = vmatprep.mubr.bf16.mxu0 %v4902_v32  ;;  %702 = vmatpush1.bf16.msra.mxu0 %v452_v15 }
  0x53   : > { %2926 = vmatmul.mubr.msk.bf16.vlgmr.msra.gmra.mxu1 %vm419_vm1, %v3543_v44  ;;  %2934 = vmatprep.subr.msk.bf16.mxu0 %vm426_vm0, %v402_v16 }
  0x54   : > { %676 = vmatprep.mubr.bf16.mxu1 %v4902_v32  ;;  %755 = vmatpush1.bf16.msra.mxu1 %v458_v17 }
  0x55   : > { %2937 = vmatprep.subr.msk.bf16.mxu1 %vm426_vm0, %v404_v18 }
  0x59   : > { %2924 = vmatmul.mubr.msk.bf16.gmra.mxu0 %vm419_vm1, %v3109_v4 }
  0x5a   : > { %719 = vmatprep.mubr.bf16.mxu0 %v4902_v32 }
  0x5b   : > { %2927 = vmatmul.mubr.msk.bf16.gmra.mxu1 %vm419_vm1, %v3109_v4 }
  0x5c   : > { %772 = vmatprep.mubr.bf16.mxu1 %v4902_v32 }
  0x61   : > { %2929 = vmatmul.mubr.msk.bf16.vlgmr.msra.gmra.mxu0 %vm419_vm1, %v3543_v44 }
  0x62   : > { %729 = vmatprep.mubr.bf16.mxu0 %v4902_v32  ;;  %808 = vmatpush1.bf16.msra.mxu0 %v464_v25 }
  0x63   : > { %2932 = vmatmul.mubr.msk.bf16.vlgmr.msra.gmra.mxu1 %vm419_vm1, %v3543_v44 }
  0x64   : > { %782 = vmatprep.mubr.bf16.mxu1 %v4902_v32  ;;  %861 = vmatpush1.bf16.msra.mxu1 %v470_v26 }
  0x69   : > { %2930 = vmatmul.mubr.msk.bf16.gmra.mxu0 %vm419_vm1, %v3109_v4 }
  0x6a   : > { %825 = vmatprep.mubr.bf16.mxu0 %v4902_v32 }
  0x6b   : > { %2933 = vmatmul.mubr.msk.bf16.gmra.mxu1 %vm419_vm1, %v3109_v4 }
  0x6c   : > { %878 = vmatprep.mubr.bf16.mxu1 %v4902_v32 }
  0x71   : > { %2935 = vmatmul.mubr.msk.bf16.vlgmr.msra.gmra.mxu0 %vm419_vm1, %v3543_v44 }
  0x72   : > { %835 = vmatprep.mubr.bf16.mxu0 %v4902_v32 }
  0x73   : > { %2938 = vmatmul.mubr.msk.bf16.vlgmr.msra.gmra.mxu1 %vm419_vm1, %v3543_v44 }
  0x74   : > { %888 = vmatprep.mubr.bf16.mxu1 %v4902_v32 }
  0x79   : > { %2936 = vmatmul.mubr.msk.bf16.gmra.mxu0 %vm419_vm1, %v3109_v4 }
  0x7a   : > { %1496 = vmatprep.mubr.bf16.mxu0 %v4902_v32 }
  0x7b   : > { %2939 = vmatmul.mubr.msk.bf16.gmra.mxu1 %vm419_vm1, %v3109_v4 }
  0x7c   : > { %1549 = vmatprep.mubr.bf16.mxu1 %v4902_v32 }
 0x101   : > { %v509_v27 = vpop.f32.mrf.mxu0 }
 0x103   : > { %v562_v30 = vpop.f32.mrf.mxu1  ;;  %v511_v31 = vpop.f32.mrf.mxu0 }
 0x105   : > { %v564_v33 = vpop.f32.mrf.mxu1  ;;  %v513_v35 = vpop.f32.mrf.mxu0 }
 0x106   : > { %v899_v36 = vpack.c.bf16 %v513_v35, %v509_v27  ;;  %v2944_v27 = vcombine.low %v3670_v11, %v3675_v12  ;;  %v3745_v12 = vld [vmem:[%s4897_s2 + $0x98] sm:$0xff] }
 0x107   : > { %v566_v37 = vpop.f32.mrf.mxu1  ;;  %v515_v41 = vpop.f32.mrf.mxu0 }
 0x108   : > { %v3640_v43 = vadd.bf16 %v2940_v34, %v899_v36  ;;  %v900_v44 = vpack.c.bf16 %v515_v41, %v511_v31  ;;  %v901_v61 = vpack.c.bf16 %v566_v37, %v562_v30  ;;  %v2946_v37 = vcombine.low %v3686_v21, %v942_v22 }
 0x109   : > { %v568_v45 = vpop.f32.mrf.mxu1  ;;  %v519_v47 = vpop.f32.mrf.mxu0 }
 0x10a   : > { %v902_v46 = vpack.c.bf16 %v568_v45, %v564_v33  ;;  %v1155_v50 = vmul.bf16 %v3640_v43, %v3640_v43  ;;  %v3650_v51 = vadd.bf16 %v2941_v40, %v900_v44  ;;  %v3679_v17 = vadd.bf16 %v2942_v62, %v901_v61 }
 0x10b   : > { %v572_v52 = vpop.f32.mrf.mxu1  ;;  %v521_v56 = vpop.f32.mrf.mxu0  ;;  %v2947_v44 = vcombine.high %v3686_v21, %v942_v22 }
 0x10c   : > { %v3658_v55 = vadd.bf16 %v2943_v42, %v902_v46  ;;  %v1187_v57 = vmul.bf16 %v1155_v50, %v3640_v43  ;;  %v1156_v58 = vmul.bf16 %v3650_v51, %v3650_v51  ;;  %v1157_v39 = vmul.bf16 %v3679_v17, %v3679_v17 }
 0x10d   : > { %v574_v59 = vpop.f32.mrf.mxu1  ;;  %v523_v0 = vpop.f32.mrf.mxu0 }
 0x10e   : > { %v1158_v63 = vmul.bf16 %v3658_v55, %v3658_v55  ;;  %v1219_v2 = vmul.bf16 1027030327, %v1187_v57  ;;  %v1188_v3 = vmul.bf16 %v1156_v58, %v3650_v51  ;;  %v915_v4 = vpack.c.bf16 %v523_v0, %v519_v47  ;;  %v3726_v57 = vld [vmem:[%s4897_s2 + $0xd0] sm:$0xff] }
 0x10f   : > { %v576_v5 = vpop.f32.mrf.mxu1  ;;  %v525_v9 = vpop.f32.mrf.mxu0 }
 0x110   : > { %v1190_v7 = vmul.bf16 %v1158_v63, %v3658_v55  ;;  %v917_v8 = vpack.c.bf16 %v576_v5, %v572_v52  ;;  %v1220_v13 = vmul.bf16 1027030327, %v1188_v3  ;;  %v3677_v14 = vadd.bf16 %v2956_v60, %v915_v4 }
 0x111   : > { %v916_v15 = vpack.c.bf16 %v525_v9, %v521_v56  ;;  %v578_v16 = vpop.f32.mrf.mxu1  ;;  %v615_v20 = vpop.f32.mrf.mxu0  ;;  %v1251_v23 = vadd.bf16 %v1219_v2, %v3640_v43  ;;  %v3721_v56 = vld [vmem:[%s4897_s2 + $0x90] sm:$0xff]  ;;  %v1189_v9 = vmul.bf16 %v1157_v39, %v3679_v17 }
 0x112   : > { %v3681_v18 = vadd.bf16 %v2958_v1, %v917_v8  ;;  %v918_v19 = vpack.c.bf16 %v578_v16, %v574_v59  ;;  %v1171_v24 = vmul.bf16 %v3677_v14, %v3677_v14  ;;  %v1252_v28 = vadd.bf16 %v1220_v13, %v3650_v51  ;;  %v3750_v13 = vld [vmem:[%s4897_s2 + $0xd8] sm:$0xff] }
 0x113   : > { %v3694_v25 = vadd.bf16 %v2957_v6, %v916_v15  ;;  %v668_v26 = vpop.f32.mrf.mxu1  ;;  %v1222_v29 = vmul.bf16 1027030327, %v1190_v7  ;;  %v617_v33 = vpop.f32.mrf.mxu0  ;;  %v1283_v45 = vmul.bf16 1061961548, %v1251_v23  ;;  %v2960_v8 = vcombine.low %v3721_v56, %v3726_v57 }
 0x114   : > { %v1173_v30 = vmul.bf16 %v3681_v18, %v3681_v18  ;;  %v3701_v31 = vadd.bf16 %v2959_v10, %v918_v19  ;;  %v1203_v34 = vmul.bf16 %v1171_v24, %v3677_v14  ;;  %v1284_v58 = vmul.bf16 1061961548, %v1252_v28 }
 0x115   : > { %v1172_v35 = vmul.bf16 %v3694_v25, %v3694_v25  ;;  %v670_v36 = vpop.f32.mrf.mxu1  ;;  %v619_v42 = vpop.f32.mrf.mxu0  ;;  %v1254_v50 = vadd.bf16 %v1222_v29, %v3658_v55  ;;  %3112 = vtanh.bf16 %v1283_v45  ;;  %v2963_v39 = vcombine.high %v3745_v12, %v3750_v13 }
 0x116   : > { %v1205_v40 = vmul.bf16 %v1173_v30, %v3681_v18  ;;  %v1174_v41 = vmul.bf16 %v3701_v31, %v3701_v31  ;;  %v1235_v46 = vmul.bf16 1027030327, %v1203_v34  ;;  %v903_v48 = vpack.c.bf16 %v619_v42, %v615_v20  ;;  %v3767_v34 = vld [vmem:[%s4897_s2 + $0x20] sm:$0xff] }
 0x117   : > { %v1204_v47 = vmul.bf16 %v1172_v35, %v3694_v25  ;;  %v672_v49 = vpop.f32.mrf.mxu1  ;;  %v621_v54 = vpop.f32.mrf.mxu0  ;;  %v1286_v15 = vmul.bf16 1061961548, %v1254_v50  ;;  %3114 = vtanh.bf16 %v1284_v58  ;;  %v3772_v35 = vld [vmem:[%s4897_s2 + $0x60] sm:$0xff] }
 0x118   : > { %v1206_v52 = vmul.bf16 %v1174_v41, %v3701_v31  ;;  %v905_v53 = vpack.c.bf16 %v672_v49, %v668_v26  ;;  %v1237_v59 = vmul.bf16 1027030327, %v1205_v40  ;;  %v3728_v61 = vadd.bf16 %v2944_v27, %v903_v48  ;;  %v3781_v40 = vld [vmem:[%s4897_s2 + $0x28] sm:$0xff]  ;;  %v3799_v48 = vld [vmem:[%s4897_s2 + $0xe0] sm:$0xff] }
 0x119   : > { %v1236_v60 = vmul.bf16 1027030327, %v1204_v47  ;;  %v904_v62 = vpack.c.bf16 %v621_v54, %v617_v33  ;;  %v674_v63 = vpop.f32.mrf.mxu1  ;;  %v1267_v0 = vadd.bf16 %v1235_v46, %v3677_v14  ;;  %v625_v4 = vpop.f32.mrf.mxu0  ;;  %v2962_v33 = vcombine.low %v3745_v12, %v3750_v13  ;;  %v3786_v41 = vld [vmem:[%s4897_s2 + $0x68] sm:$0xff]  ;;  %v3794_v47 = vld [vmem:[%s4897_s2 + $0xa0] sm:$0xff] }
 0x11a   : > { %4913 = vst [vmem:[#allocation6_spill] sm:$0xff] %v3728_v61  ;;  %v1238_v1 = vmul.bf16 1027030327, %v1206_v52  ;;  %v3731_v2 = vadd.bf16 %v2946_v37, %v905_v53  ;;  %v906_v3 = vpack.c.bf16 %v674_v63, %v670_v36  ;;  %v1159_v6 = vmul.bf16 %v3728_v61, %v3728_v61  ;;  %v3810_v54 = vld [vmem:[%s4897_s2 + $0xa8] sm:$0xff] }
 0x11b   : > { %v1268_v5 = vadd.bf16 %v1236_v60, %v3694_v25  ;;  %v678_v7 = vpop.f32.mrf.mxu1  ;;  %v3740_v11 = vpop.f32.mrf.mxu0  ;;  %v3754_v19 = vadd.bf16 %v2945_v38, %v904_v62  ;;  %v1299_v22 = vmul.bf16 1061961548, %v1267_v0  ;;  %v1269_v23 = vadd.bf16 %v1237_v59, %v3681_v18 }
 0x11c   : > { %4914 = vst [vmem:[#allocation7_spill] sm:$0xff] %v3731_v2  ;;  %v1270_v10 = vadd.bf16 %v1238_v1, %v3701_v31  ;;  %v1161_v16 = vmul.bf16 %v3731_v2, %v3731_v2  ;;  %v3759_v24 = vadd.bf16 %v2947_v44, %v906_v3  ;;  %v1191_v28 = vmul.bf16 %v1159_v6, %v3728_v61  ;;  %v3841_v6 = vld [vmem:[%s4897_s2 + $0x70] sm:$0xff] }
 0x11d   : > { %4915 = vst [vmem:[#allocation8_spill] sm:$0xff] %v3754_v19  ;;  %v3756_v20 = vpop.f32.mrf.mxu1  ;;  %v1300_v21 = vmul.bf16 1061961548, %v1268_v5  ;;  %v629_v26 = vpop.f32.mrf.mxu0  ;;  %v1221_v36 = vmul.bf16 1027030327, %v1189_v9  ;;  %v2961_v38 = vcombine.high %v3721_v56, %v3726_v57  ;;  %v1160_v44 = vmul.bf16 %v3754_v19, %v3754_v19  ;;  %v3815_v56 = vld [vmem:[%s4897_s2 + $0xe8] sm:$0xff] }
 0x11e   : > { %4916 = vst [vmem:[#allocation9_spill] sm:$0xff] %v3759_v24  ;;  %v1302_v27 = vmul.bf16 1061961548, %v1270_v10  ;;  %v919_v29 = vpack.c.bf16 %v629_v26, %v625_v4  ;;  %v1193_v42 = vmul.bf16 %v1161_v16, %v3731_v2  ;;  %v1301_v49 = vmul.bf16 1061961548, %v1269_v23  ;;  %v3836_v5 = vld [vmem:[%s4897_s2 + $0x30] sm:$0xff] }
 0x11f   : > { %v682_v30 = vpop.f32.mrf.mxu1  ;;  %3116 = vtanh.bf16 %v1300_v21  ;;  %v631_v37 = vpop.f32.mrf.mxu0  ;;  %v1162_v50 = vmul.bf16 %v3759_v24, %v3759_v24  ;;  %v2948_v53 = vcombine.low %v3767_v34, %v3772_v35  ;;  %v1223_v57 = vmul.bf16 1027030327, %v1191_v28  ;;  %v3858_v16 = vld [vmem:[%s4897_s2 + $0x78] sm:$0xff] }
 0x120   : > { %3118 = vtanh.bf16 %v1286_v15  ;;  %v921_v45 = vpack.c.bf16 %v682_v30, %v678_v7  ;;  %v3817_v58 = vadd.bf16 %v2960_v8, %v919_v29  ;;  %v1253_v63 = vadd.bf16 %v1221_v36, %v3679_v17  ;;  %v3853_v15 = vld [vmem:[%s4897_s2 + $0x38] sm:$0xff]  ;;  %v3879_v36 = vld [vmem:[%s4897_s2 + $0xf0] sm:$0xff] }
 0x121   : > { %v684_v46 = vpop.f32.mrf.mxu1  ;;  %3120 = vtanh.bf16 %v1302_v27  ;;  %v3803_v52 = vpop.f32.mrf.mxu0  ;;  %v920_v0 = vpack.c.bf16 %v631_v37, %v3740_v11  ;;  %v1225_v7 = vmul.bf16 1027030327, %v1193_v42  ;;  %v1192_v8 = vmul.bf16 %v1160_v44, %v3754_v19 }
 0x122   : > { %3122 = vtanh.bf16 %v1299_v22  ;;  %4917 = vst [vmem:[#allocation10_spill] sm:$0xff] %v3817_v58  ;;  %v3844_v9 = vadd.bf16 %v2962_v33, %v921_v45  ;;  %v1194_v21 = vmul.bf16 %v1162_v50, %v3759_v24  ;;  %v922_v22 = vpack.c.bf16 %v684_v46, %v3756_v20  ;;  %v3874_v20 = vld [vmem:[%s4897_s2 + $0xb0] sm:$0xff]  ;;  %v3895_v50 = vld [vmem:[%s4897_s2 + $0xf8] sm:$0xff] }
 0x123   : > { %v3819_v59 = vpop.f32.mrf.mxu1  ;;  %v3827_v1 = vpop.f32.mrf.mxu0  ;;  %3124 = vtanh.bf16 %v1301_v49  ;;  %v1255_v27 = vadd.bf16 %v1223_v57, %v3728_v61  ;;  %v1175_v28 = vmul.bf16 %v3817_v58, %v3817_v58  ;;  %v1285_v37 = vmul.bf16 1061961548, %v1253_v63  ;;  %v3890_v49 = vld [vmem:[%s4897_s2 + $0xb8] sm:$0xff] }
 0x124   : > { %4918 = vst [vmem:[#allocation11_spill] sm:$0xff] %v3844_v9  ;;  %v3881_v42 = vadd.bf16 %v2961_v38, %v920_v0  ;;  %v3898_v38 = vadd.bf16 %v1225_v7, %v3731_v2  ;;  %v1224_v57 = vmul.bf16 1027030327, %v1192_v8  ;;  %v1177_v63 = vmul.bf16 %v3844_v9, %v3844_v9  ;;  %v3903_v32 = vpop.eup %3112 }
 0x125   : > { %v3846_v10 = vpop.f32.mrf.mxu1  ;;  %v725_v23 = vpop.f32.mrf.mxu0  ;;  %v1226_v45 = vmul.bf16 1027030327, %v1194_v21  ;;  %v3908_v33 = vadd.bf16 %v2963_v39, %v922_v22  ;;  %v1287_v11 = vmul.bf16 1061961548, %v1255_v27  ;;  %3126 = vtanh.bf16 %v1285_v37 }
 0x126   : > { %v907_v0 = vpack.c.bf16 %v725_v23, %v3803_v52  ;;  %v3115_v26 = vpop.eup %3114  ;;  %v1207_v52 = vmul.bf16 %v1175_v28, %v3817_v58  ;;  %v1176_v13 = vmul.bf16 %v3881_v42, %v3881_v42  ;;  %v3928_v8 = vadd.bf16 %v1224_v57, %v3754_v19 }
 0x127   : > { %v778_v29 = vpop.f32.mrf.mxu1  ;;  %v727_v44 = vpop.f32.mrf.mxu0  ;;  %v1209_v21 = vmul.bf16 %v1177_v63, %v3844_v9  ;;  %v1178_v27 = vmul.bf16 %v3908_v33, %v3908_v33  ;;  %3128 = vtanh.bf16 %v1287_v11 }
 0x128   : > { %v909_v39 = vpack.c.bf16 %v778_v29, %v3819_v59  ;;  %v3934_v37 = vadd.bf16 %v2948_v53, %v907_v0  ;;  %v3941_v29 = vadd.bf16 %v1226_v45, %v3759_v24  ;;  %v908_v57 = vpack.c.bf16 %v727_v44, %v3827_v1 }
 0x129   : > { %v780_v46 = vpop.f32.mrf.mxu1  ;;  %v731_v30 = vpop.f32.mrf.mxu0  ;;  %v1239_v4 = vmul.bf16 1027030327, %v1207_v52  ;;  %v1348_v0 = vadd.bf16 1065369472, %v3115_v26  ;;  %v1208_v2 = vmul.bf16 %v1176_v13, %v3881_v42  ;;  %v4919_v45 = vcombine.low %v3781_v40, %v3786_v41 }
 0x12a   : > { %v910_v19 = vpack.c.bf16 %v780_v46, %v3846_v10  ;;  %v1241_v44 = vmul.bf16 1027030327, %v1209_v21  ;;  %v1163_v11 = vmul.bf16 %v3934_v37, %v3934_v37  ;;  %v1210_v52 = vmul.bf16 %v1178_v27, %v3908_v33 }
 0x12b   : > { %v784_v23 = vpop.f32.mrf.mxu1  ;;  %v3922_v22 = vpop.f32.mrf.mxu0  ;;  %v3950_v24 = vadd.bf16 %v4919_v45, %v909_v39  ;;  %v4920_v13 = vcombine.high %v3767_v34, %v3772_v35  ;;  %v1271_v21 = vadd.bf16 %v1239_v4, %v3817_v58  ;;  %v4921_v45 = vcombine.low %v3794_v47, %v3799_v48 }
 0x12c   : > { %v1240_v34 = vmul.bf16 1027030327, %v1208_v2  ;;  %v4923_v2 = vcombine.low %v3810_v54, %v3815_v56  ;;  %v4925_v58 = vmul.bf16 1061961548, %v3898_v38 }
 0x12d   : > { %v3117_v7 = vpop.eup %3116  ;;  %v3936_v12 = vpop.f32.mrf.mxu1  ;;  %v1165_v35 = vmul.bf16 %v3950_v24, %v3950_v24 }
 0x12e   : > { %v3938_v59 = vpop.eup %3118  ;;  %v735_v28 = vpop.f32.mrf.mxu0  ;;  %v1364_v3 = vadd.bf16 1065369472, %v3117_v7  ;;  %3130 = vtanh.bf16 %v4925_v58 }
 0x12f   : > { %v3121_v63 = vpop.eup %3120  ;;  %v923_v62 = vpack.c.bf16 %v735_v28, %v731_v30  ;;  %v788_v53 = vpop.f32.mrf.mxu1  ;;  %v3960_v28 = vadd.bf16 %v4920_v13, %v908_v57  ;;  %v1350_v46 = vadd.bf16 1065369472, %v3938_v59  ;;  %v4922_v57 = vcombine.high %v3781_v40, %v3786_v41 }
 0x130   : > { %v3123_v60 = vpop.eup %3122  ;;  %v737_v61 = vpop.f32.mrf.mxu0  ;;  %v925_v30 = vpack.c.bf16 %v788_v53, %v784_v23  ;;  %v1396_v26 = vmul.bf16 1056980736, %v1364_v3  ;;  %v1366_v10 = vadd.bf16 1065369472, %v3121_v63  ;;  %v1380_v53 = vmul.bf16 1056980736, %v1348_v0 }
 0x131   : > { %v790_v7 = vpop.f32.mrf.mxu1  ;;  %v3969_v23 = vadd.bf16 %v4921_v45, %v923_v62  ;;  %v1363_v27 = vadd.bf16 1065369472, %v3123_v60  ;;  %v3125_v1 = vpop.eup %3124  ;;  %v3978_v59 = vadd.bf16 %v4922_v57, %v910_v19  ;;  %v924_v4 = vpack.c.bf16 %v737_v61, %v3922_v22 }
 0x132   : > { %v3962_v39 = vpop.f32.mrf.mxu0  ;;  %v3984_v62 = vadd.bf16 %v1241_v44, %v3844_v9  ;;  %v1195_v60 = vmul.bf16 %v1163_v11, %v3934_v37  ;;  %v3990_v0 = vadd.bf16 %v4923_v2, %v925_v30  ;;  %v1428_v40 = vmul.bf16 %v1396_v26, %v3694_v25 }
 0x133   : > { %v3971_v3 = vpop.f32.mrf.mxu1  ;;  %v1242_v19 = vmul.bf16 1027030327, %v1210_v52  ;;  %v1164_v61 = vmul.bf16 %v3960_v28, %v3960_v28  ;;  %v926_v41 = vpack.c.bf16 %v790_v7, %v3936_v12  ;;  %v1398_v22 = vmul.bf16 1056980736, %v1366_v10  ;;  %v3127_v9 = vpop.eup %3126 }
 0x134   : > { %v3981_v63 = vpop.f32.mrf.mxu0  ;;  %v1303_v45 = vmul.bf16 1061961548, %v1271_v21  ;;  %v1179_v11 = vmul.bf16 %v3969_v23, %v3969_v23  ;;  %1476 = vmatprep.subr.bf16.mxu0 %v1428_v40  ;;  %v1395_v30 = vmul.bf16 1056980736, %v1363_v27  ;;  %v1365_v57 = vadd.bf16 1065369472, %v3125_v1 }
 0x135   : > { %v3992_v13 = vpop.f32.mrf.mxu1  ;;  %v1197_v25 = vmul.bf16 %v1165_v35, %v3950_v24  ;;  %v1166_v26 = vmul.bf16 %v3978_v59, %v3978_v59  ;;  %v4924_v12 = vcombine.high %v3794_v47, %v3799_v48  ;;  %v1430_v52 = vmul.bf16 %v1398_v22, %v3701_v31 }
 0x136   : > { %v3998_v44 = vpop.f32.mrf.mxu0  ;;  %v1227_v21 = vmul.bf16 1027030327, %v1195_v60  ;;  %v1181_v1 = vmul.bf16 %v3990_v0, %v3990_v0  ;;  %v1427_v27 = vmul.bf16 %v1395_v30, %v3677_v14  ;;  %v1397_v40 = vmul.bf16 1056980736, %v1365_v57 }
 0x137   : > { %v4002_v2 = vpop.f32.mrf.mxu1  ;;  %v4010_v7 = vadd.bf16 %v4924_v12, %v924_v4  ;;  %v4023_v47 = vadd.bf16 %v1240_v34, %v3881_v42  ;;  %v1196_v31 = vmul.bf16 %v1164_v61, %v3960_v28  ;;  %v4926_v48 = vcombine.high %v3810_v54, %v3815_v56  ;;  %1529 = vmatprep.subr.bf16.mxu1 %v1430_v52 }
 0x138   : > { %v4013_v10 = vpop.f32.mrf.mxu0  ;;  %v1305_v14 = vmul.bf16 1061961548, %v3984_v62  ;;  %v1211_v22 = vmul.bf16 %v1179_v11, %v3969_v23  ;;  %1477 = vmatpush1.bf16.msra.mxu0 %v1427_v27  ;;  %v1429_v58 = vmul.bf16 %v1397_v40, %v3681_v18  ;;  %v1412_v38 = vmul.bf16 %v1380_v53, %v3650_v51  ;;  %v4045_v62 = vpop.eup %3128 }
 0x139   : > { %v4018_v35 = vpop.f32.mrf.mxu1  ;;  %v4029_v4 = vadd.bf16 %v4926_v48, %v926_v41  ;;  %3132 = vtanh.bf16 %v1303_v45  ;;  %v4040_v54 = vadd.bf16 %v1242_v19, %v3908_v33  ;;  %v1198_v56 = vmul.bf16 %v1166_v26, %v3978_v59 }
 0x13a   : > { %v4031_v60 = vpop.f32.mrf.mxu0  ;;  %v1180_v61 = vmul.bf16 %v4010_v7, %v4010_v7  ;;  %v4048_v11 = vadd.bf16 %v1227_v21, %v3934_v37  ;;  %v1229_v18 = vmul.bf16 1027030327, %v1197_v25  ;;  %v1213_v51 = vmul.bf16 %v1181_v1, %v3990_v0  ;;  %1530 = vmatpush1.bf16.msra.mxu1 %v1429_v58  ;;  %1478 = vmatprep.subr.bf16.mxu0 %v1412_v38 }
 0x13b   : > { %v4037_v34 = vpop.f32.mrf.mxu1  ;;  %v1382_v53 = vmul.bf16 1056980736, %v1350_v46  ;;  %v1228_v19 = vmul.bf16 1027030327, %v1196_v31  ;;  %v1182_v30 = vmul.bf16 %v4029_v4, %v4029_v4  ;;  %v911_v57 = vpack.c.bf16 %v3998_v44, %v3962_v39 }
 0x13c   : > { %v839_v41 = vpop.f32.mrf.mxu0  ;;  %v4927_v26 = vadd.bf16 1065369472, %v3903_v32  ;;  %v1243_v21 = vmul.bf16 1027030327, %v1211_v22  ;;  %v913_v25 = vpack.c.bf16 %v4002_v2, %v3971_v3  ;;  %v1349_v27 = vadd.bf16 1065369472, %v3127_v9 }
 0x13d   : > { %v892_v45 = vpop.f32.mrf.mxu1  ;;  %v1414_v1 = vmul.bf16 %v1382_v53, %v3658_v55  ;;  %3134 = vtanh.bf16 %v1305_v14  ;;  %v1230_v40 = vmul.bf16 1027030327, %v1198_v56  ;;  %v1212_v31 = vmul.bf16 %v1180_v61, %v4010_v7  ;;  %v4065_v32 = vld [vmem:[%s4898_s3] sm:$0xff]  }
 0x13e   : > { %v1379_v12 = vmul.bf16 1056980736, %v4927_v26  ;;  %v841_v52 = vpop.f32.mrf.mxu0  ;;  %v1291_v44 = vmul.bf16 1061961548, %v4048_v11  ;;  %v1261_v3 = vadd.bf16 %v1229_v18, %v3950_v24  ;;  %v1245_v2 = vmul.bf16 1027030327, %v1213_v51 }
 0x13f   : > { %v894_v46 = vpop.f32.mrf.mxu1  ;;  %1531 = vmatprep.subr.bf16.mxu1 %v1414_v1  ;;  %v1381_v55 = vmul.bf16 1056980736, %v1349_v27  ;;  %v4070_v9 = vadd.bf16 %v1228_v19, %v3960_v28  ;;  %v4928_v14 = vcombine.low %v3836_v5, %v3841_v6  ;;  %v927_v22 = vpack.c.bf16 %v841_v52, %v4031_v60 }
 0x140   : > { %v1411_v48 = vmul.bf16 %v1379_v12, %v3640_v43  ;;  %v843_v39 = vpop.f32.mrf.mxu0  ;;  %v1275_v56 = vadd.bf16 %v1243_v21, %v3969_v23  ;;  %v1214_v61 = vmul.bf16 %v1182_v30, %v4029_v4  ;;  %v4929_v11 = vcombine.low %v3853_v15, %v3858_v16 }
 0x141   : > { %v4075_v43 = vadd.bf16 %v4928_v14, %v911_v57  ;;  %v928_v58 = vpack.c.bf16 %v843_v39, %v839_v41  ;;  %v896_v38 = vpop.f32.mrf.mxu1  ;;  %v1413_v51 = vmul.bf16 %v1381_v55, %v3679_v17  ;;  %v4087_v53 = vadd.bf16 %v1230_v40, %v3978_v59 }
 0x142   : > { %1479 = vmatpush1.bf16.msra.mxu0 %v1411_v48  ;;  %v4083_v18 = vadd.bf16 %v4929_v11, %v913_v25  ;;  %v1244_v19 = vmul.bf16 1027030327, %v1212_v31  ;;  %v929_v57 = vpack.c.bf16 %v894_v46, %v4037_v34  ;;  %v4930_v60 = vcombine.high %v3874_v20, %v3879_v36 }
 0x143   : > { %v1293_v26 = vmul.bf16 1061961548, %v1261_v3  ;;  %v1277_v30 = vadd.bf16 %v1245_v2, %v3990_v0  ;;  %v912_v12 = vpack.c.bf16 %v4013_v10, %v3981_v63  ;;  %1532 = vmatpush1.bf16.msra.mxu1 %v1413_v51  ;;  %v930_v17 = vpack.c.bf16 %v896_v38, %v892_v45 }
 0x144   : > { %v4093_v41 = vadd.bf16 %v4930_v60, %v928_v58  ;;  %v1167_v52 = vmul.bf16 %v4075_v43, %v4075_v43  ;;  %v914_v34 = vpack.c.bf16 %v4018_v35, %v3992_v13  ;;  %v4931_v21 = vcombine.low %v3874_v20, %v3879_v36  ;;  %v4119_v13 = vpop.eup %3130 }
 0x145   : > { %2974 = vmatmul.mubr.msk.bf16.vlgmr.msra.gmra.mxu0 %vm1457_vm2, %v4065_v32  ;;  %v4932_v63 = vmov 0   ;;  %v1307_v10 = vmul.bf16 1061961548, %v1275_v56  ;;  %v1246_v27 = vmul.bf16 1027030327, %v1214_v61  ;;  %v1169_v45 = vmul.bf16 %v4083_v18, %v4083_v18 }
 0x146   : > { %v4107_v25 = vadd.bf16 %v4931_v21, %v927_v22  ;;  %v1184_v1 = vmul.bf16 %v4093_v41, %v4093_v41  ;;  %1506 = vmatprep.mubr.bf16.mxu0 %v4932_v63  ;;  %v4933_v46 = vcombine.high %v3890_v49, %v3895_v50  ;;  %v1276_v20 = vadd.bf16 %v1244_v19, %v4010_v7 }
 0x147   : > { %2976 = vmatmul.mubr.msk.bf16.vlgmr.msra.gmra.mxu1 %vm1457_vm2, %v4065_v32  ;;  %v4934_v36 = vcombine.low %v3890_v49, %v3895_v50  ;;  %v1304_v48 = vmul.bf16 1061961548, %v4023_v47  ;;  %v1309_v39 = vmul.bf16 1061961548, %v1277_v30  ;;  %v4935_v3 = vcombine.high %v3836_v5, %v3841_v6  ;;  %v4142_v49 = vld [vmem:[%s4898_s3 + $0x8] sm:$0xff]   ;;  %v4145_v14 = vpop.eup %3132 }
 0x148   : > { %v4117_v40 = vadd.bf16 %v4933_v46, %v930_v17  ;;  %v1216_v31 = vmul.bf16 %v1184_v1, %v4093_v41  ;;  %1559 = vmatprep.mubr.bf16.mxu1 %v4932_v63  ;;  %v1306_v50 = vmul.bf16 1061961548, %v4040_v54  ;;  %v1199_v47 = vmul.bf16 %v1167_v52, %v4075_v43 }
 0x149   : > { %v4127_v35 = vadd.bf16 %v4934_v36, %v929_v57  ;;  %v4134_v2 = vadd.bf16 %v4935_v3, %v912_v12  ;;  %v4936_v5 = vcombine.high %v3853_v15, %v3858_v16  ;;  %v1183_v22 = vmul.bf16 %v4107_v25, %v4107_v25 }
 0x14a   : > { %v1186_v55 = vmul.bf16 %v4117_v40, %v4117_v40  ;;  %3136 = vtanh.bf16 %v1304_v48  ;;  %v1278_v58 = vadd.bf16 %v1246_v27, %v4029_v4  ;;  %v1201_v38 = vmul.bf16 %v1169_v45, %v4083_v18 }
 0x14b   : > { %v4151_v6 = vadd.bf16 %v4936_v5, %v914_v34  ;;  %3138 = vtanh.bf16 %v1306_v50  ;;  %v1185_v54 = vmul.bf16 %v4127_v35, %v4127_v35  ;;  %v1248_v61 = vmul.bf16 1027030327, %v1216_v31  ;;  %v3135_v19 = vpop.eup %3134 }
 0x14c   : > { %v1218_v56 = vmul.bf16 %v1186_v55, %v4117_v40  ;;  %3140 = vtanh.bf16 %v1291_v44  ;;  %v1288_v15 = vmul.bf16 1061961548, %v3928_v8  ;;  %v1168_v16 = vmul.bf16 %v4134_v2, %v4134_v2 }
 0x14d   : > { %3142 = vtanh.bf16 %v1293_v26  ;;  %2975 = vmatmul.mubr.msk.bf16.gmra.mxu0 %vm1457_vm2, %v4142_v49  ;;  %v1290_v51 = vmul.bf16 1061961548, %v3941_v29  ;;  %v1231_v57 = vmul.bf16 1027030327, %v1199_v47  ;;  %v1170_v44 = vmul.bf16 %v4151_v6, %v4151_v6 }
 0x14e   : > { %v1250_v11 = vmul.bf16 1027030327, %v1218_v56  ;;  %3144 = vtanh.bf16 %v1307_v10  ;;  %v1215_v60 = vmul.bf16 %v1183_v22, %v4107_v25  ;;  %1602 = vmatprep.mubr.bf16.mxu0 %v4932_v63  ;;  %v1233_v8 = vmul.bf16 1027030327, %v1201_v38 }
 0x14f   : > { %3146 = vtanh.bf16 %v1309_v39  ;;  %v1308_v26 = vmul.bf16 1061961548, %v1276_v20  ;;  %v1310_v30 = vmul.bf16 1061961548, %v1278_v58  ;;  %v1217_v12 = vmul.bf16 %v1185_v54, %v4127_v35  ;;  %2977 = vmatmul.mubr.msk.bf16.gmra.mxu1 %vm1457_vm2, %v4142_v49 }
 0x150   : > { %v1280_v17 = vadd.bf16 %v1248_v61, %v4093_v41  ;;  %v1282_v29 = vadd.bf16 %v1250_v11, %v4117_v40  ;;  %3148 = vtanh.bf16 %v1288_v15  ;;  %v1200_v52 = vmul.bf16 %v1168_v16, %v4134_v2  ;;  %1655 = vmatprep.mubr.bf16.mxu1 %v4932_v63 }
 0x151   : > { %3150 = vtanh.bf16 %v1290_v51  ;;  %v1292_v34 = vmul.bf16 1061961548, %v4070_v9  ;;  %v1294_v21 = vmul.bf16 1061961548, %v4087_v53  ;;  %v1202_v1 = vmul.bf16 %v1170_v44, %v4151_v6 }
 0x152   : > { %v1247_v10 = vmul.bf16 1027030327, %v1215_v60  ;;  %3152 = vtanh.bf16 %v1308_v26  ;;  %v1263_v27 = vadd.bf16 %v1231_v57, %v4075_v43  ;;  %v1249_v45 = vmul.bf16 1027030327, %v1217_v12 }
 0x153   : > { %3154 = vtanh.bf16 %v1310_v30  ;;  %v1312_v46 = vmul.bf16 1061961548, %v1280_v17  ;;  %v1314_v20 = vmul.bf16 1061961548, %v1282_v29  ;;  %v1265_v36 = vadd.bf16 %v1233_v8, %v4083_v18  ;;  %v4937_v29 = vld [vmem:[#allocation10_spill] sm:$0xff] }
 0x154   : > { %3156 = vtanh.bf16 %v1292_v34  ;;  %v1232_v31 = vmul.bf16 1027030327, %v1200_v52  ;;  %v1367_v48 = vadd.bf16 1065369472, %v4145_v14  ;;  %v1234_v9 = vmul.bf16 1027030327, %v1202_v1 }
 0x155   : > { %3158 = vtanh.bf16 %v1294_v21  ;;  %v1279_v53 = vadd.bf16 %v1247_v10, %v4107_v25  ;;  %v1369_v39 = vadd.bf16 1065369472, %v3135_v19  ;;  %v1295_v55 = vmul.bf16 1061961548, %v1263_v27 }
 0x156   : > { %3160 = vtanh.bf16 %v1312_v46  ;;  %v1281_v50 = vadd.bf16 %v1249_v45, %v4127_v35  ;;  %v1297_v5 = vmul.bf16 1061961548, %v1265_v36  ;;  %v1264_v22 = vadd.bf16 %v1232_v31, %v4134_v2 }
 0x157   : > { %3162 = vtanh.bf16 %v1314_v20  ;;  %v1399_v38 = vmul.bf16 1056980736, %v1367_v48  ;;  %v1266_v14 = vadd.bf16 %v1234_v9, %v4151_v6  ;;  %v1311_v54 = vmul.bf16 1061961548, %v1279_v53  ;;  %v4939_v53 = vld [vmem:[#allocation6_spill] sm:$0xff] }
 0x158   : > { %v3137_v3 = vpop.eup %3136  ;;  %v1351_v15 = vadd.bf16 1065369472, %v4045_v62  ;;  %v1401_v51 = vmul.bf16 1056980736, %v1369_v39  ;;  %v1353_v19 = vadd.bf16 1065369472, %v4119_v13  ;;  %3164 = vtanh.bf16 %v1295_v55 }
 0x159   : > { %v3139_v47 = vpop.eup %3138  ;;  %v1368_v58 = vadd.bf16 1065369472, %v3137_v3  ;;  %v1313_v44 = vmul.bf16 1061961548, %v1281_v50  ;;  %3166 = vtanh.bf16 %v1297_v5  ;;  %v1296_v30 = vmul.bf16 1061961548, %v1264_v22 }
 0x15a   : > { %v4186_v56 = vpop.eup %3140  ;;  %v1370_v61 = vadd.bf16 1065369472, %v3139_v47  ;;  %v1431_v62 = vmul.bf16 %v1399_v38, %v4937_v29  ;;  %v1383_v52 = vmul.bf16 1056980736, %v1351_v15  ;;  %v1298_v34 = vmul.bf16 1061961548, %v1266_v14 }
 0x15b   : > { %v4190_v16 = vpop.eup %3142  ;;  %v1400_v11 = vmul.bf16 1056980736, %v1368_v58  ;;  %3168 = vtanh.bf16 %v1311_v54  ;;  %v4938_v13 = vld [vmem:[#allocation11_spill] sm:$0xff]  ;;  %v1385_v27 = vmul.bf16 1056980736, %v1353_v19  ;;  %v4940_v50 = vld [vmem:[#allocation8_spill] sm:$0xff] }
 0x15c   : > { %v3145_v57 = vpop.eup %3144  ;;  %v1402_v60 = vmul.bf16 1056980736, %v1370_v61  ;;  %v1433_v1 = vmul.bf16 %v1401_v51, %v4938_v13  ;;  %3170 = vtanh.bf16 %v1313_v44  ;;  %v1415_v39 = vmul.bf16 %v1383_v52, %v4939_v53  ;;  %v4941_v5 = vld [vmem:[#allocation7_spill] sm:$0xff]  ;;  %v4942_v54 = vld [vmem:[#allocation9_spill] sm:$0xff] }
 0x15d   : > { %v3147_v8 = vpop.eup %3146  ;;  %v1432_v26 = vmul.bf16 %v1400_v11, %v3881_v42  ;;  %v1371_v46 = vadd.bf16 1065369472, %v3145_v57  ;;  %3172 = vtanh.bf16 %v1296_v30  ;;  %v1417_v22 = vmul.bf16 %v1385_v27, %v4941_v5  ;;  %v1929_v5 = vld [vmem:[%s4899_s4 + $0x48] sm:$0xff] }
 0x15e   : > { %v3149_v12 = vpop.eup %3148  ;;  %v1434_v17 = vmul.bf16 %v1402_v60, %v3908_v33  ;;  %v1373_v31 = vadd.bf16 1065369472, %v3147_v8  ;;  %3174 = vtanh.bf16 %v1298_v34  ;;  %v1355_v60 = vadd.bf16 1065369472, %v4186_v56 }
 0x15f   : > { %v3151_v21 = vpop.eup %3150  ;;  %1582 = vmatprep.subr.bf16.mxu0 %v1432_v26  ;;  %v1352_v10 = vadd.bf16 1065369472, %v3149_v12  ;;  %v1403_v11 = vmul.bf16 1056980736, %v1371_v46  ;;  %v1357_v12 = vadd.bf16 1065369472, %v4190_v16 }
 0x160   : > { %v3153_v45 = vpop.eup %3152  ;;  %1635 = vmatprep.subr.bf16.mxu1 %v1434_v17  ;;  %1583 = vmatpush1.bf16.msra.mxu0 %v1431_v62  ;;  %v1354_v42 = vadd.bf16 1065369472, %v3151_v21  ;;  %v1405_v44 = vmul.bf16 1056980736, %v1373_v31  ;;  %v1387_v56 = vmul.bf16 1056980736, %v1355_v60 }
 0x161   : > { %v3155_v20 = vpop.eup %3154  ;;  %1636 = vmatpush1.bf16.msra.mxu1 %v1433_v1  ;;  %v1384_v33 = vmul.bf16 1056980736, %v1352_v10  ;;  %v1372_v36 = vadd.bf16 1065369472, %v3153_v45  ;;  %v1389_v21 = vmul.bf16 1056980736, %v1357_v12 }
 0x162   : > { %v3157_v48 = vpop.eup %3156  ;;  %v1386_v9 = vmul.bf16 1056980736, %v1354_v42  ;;  %v1374_v3 = vadd.bf16 1065369472, %v3155_v20  ;;  %v1419_v27 = vmul.bf16 %v1387_v56, %v3934_v37  ;;  %v1936_v60 = vld [vmem:[%s4899_s4 + $0x80] sm:$0xff] }
 0x163   : > { %v3159_v55 = vpop.eup %3158  ;;  %v1416_v47 = vmul.bf16 %v1384_v33, %v4940_v50  ;;  %v1404_v58 = vmul.bf16 1056980736, %v1372_v36  ;;  %v1356_v38 = vadd.bf16 1065369472, %v3157_v48 }
 0x164   : > { %v3161_v14 = vpop.eup %3160  ;;  %v1418_v61 = vmul.bf16 %v1386_v9, %v4942_v54  ;;  %v1406_v15 = vmul.bf16 1056980736, %v1374_v3  ;;  %v1358_v51 = vadd.bf16 1065369472, %v3159_v55 }
 0x165   : > { %v3163_v19 = vpop.eup %3162  ;;  %1584 = vmatprep.subr.bf16.mxu0 %v1416_v47  ;;  %v1436_v57 = vmul.bf16 %v1404_v58, %v4010_v7  ;;  %v1376_v8 = vadd.bf16 1065369472, %v3161_v14  ;;  %v1388_v30 = vmul.bf16 1056980736, %v1356_v38  ;;  %v1435_v7 = vmul.bf16 %v1403_v11, %v3969_v23 }
 0x166   : > { %1637 = vmatprep.subr.bf16.mxu1 %v1418_v61  ;;  %1585 = vmatpush1.bf16.msra.mxu0 %v1415_v39  ;;  %v1438_v26 = vmul.bf16 %v1406_v15, %v4029_v4  ;;  %v1378_v17 = vadd.bf16 1065369472, %v3163_v19  ;;  %v1390_v29 = vmul.bf16 1056980736, %v1358_v51  ;;  %v3165_v34 = vpop.eup %3164  ;;  %v1437_v4 = vmul.bf16 %v1405_v44, %v3990_v0 }
 0x167   : > { %1638 = vmatpush1.bf16.msra.mxu1 %v1417_v22  ;;  %1688 = vmatprep.subr.bf16.mxu0 %v1436_v57  ;;  %v1408_v62 = vmul.bf16 1056980736, %v1376_v8  ;;  %v1420_v16 = vmul.bf16 %v1388_v30, %v3960_v28  ;;  %v3167_v13 = vpop.eup %3166  ;;  %v1421_v28 = vmul.bf16 %v1389_v21, %v3950_v24  ;;  %v1359_v20 = vadd.bf16 1065369472, %v3165_v34  ;;  %v1944_v8 = vld [vmem:[%s4899_s4 + $0xc0] sm:$0xff] }
 0x168   : > { %1741 = vmatprep.subr.bf16.mxu1 %v1438_v26  ;;  %v1410_v52 = vmul.bf16 1056980736, %v1378_v17  ;;  %v1422_v1 = vmul.bf16 %v1390_v29, %v3978_v59  ;;  %v1361_v31 = vadd.bf16 1065369472, %v3167_v13  ;;  %v3006_v34 = vcombine.low %v1936_v60, %v1944_v8 }
 0x169   : > { %2978 = vmatmul.mubr.msk.bf16.vlgmr.msra.gmra.mxu0 %vm1457_vm2, %v4065_v32  ;;  %v1440_v23 = vmul.bf16 %v1408_v62, %v4093_v41  ;;  %v3169_v10 = vpop.eup %3168  ;;  %v1391_v53 = vmul.bf16 1056980736, %v1359_v20 }
 0x16a   : > { %2980 = vmatmul.mubr.msk.bf16.vlgmr.msra.gmra.mxu1 %vm1457_vm2, %v4065_v32  ;;  %1612 = vmatprep.mubr.bf16.mxu0 %v4932_v63  ;;  %v1442_v45 = vmul.bf16 %v1410_v52, %v4117_v40  ;;  %v3171_v0 = vpop.eup %3170  ;;  %v1375_v59 = vadd.bf16 1065369472, %v3169_v10  ;;  %v1393_v55 = vmul.bf16 1056980736, %v1361_v31 }
 0x16b   : > { %1665 = vmatprep.mubr.bf16.mxu1 %v4932_v63  ;;  %1689 = vmatpush1.bf16.msra.mxu0 %v1435_v7  ;;  %v3173_v42 = vpop.eup %3172  ;;  %v1377_v37 = vadd.bf16 1065369472, %v3171_v0  ;;  %v3007_v0 = vcombine.high %v1936_v60, %v1944_v8 }
 0x16c   : > { %1742 = vmatpush1.bf16.msra.mxu1 %v1437_v4  ;;  %1690 = vmatprep.subr.bf16.mxu0 %v1420_v16  ;;  %v3175_v46 = vpop.eup %3174  ;;  %v1360_v41 = vadd.bf16 1065369472, %v3173_v42  ;;  %v1407_v40 = vmul.bf16 1056980736, %v1375_v59  ;;  %v1425_v47 = vmul.bf16 %v1393_v55, %v4083_v18  ;;  %v1920_v18 = vld [vmem:[%s4899_s4] sm:$0xff]  ;;  %v1937_v4 = vld [vmem:[%s4899_s4 + $0x88] sm:$0xff] }
 0x16d   : > { %1743 = vmatprep.subr.bf16.mxu1 %v1422_v1  ;;  %v1362_v24 = vadd.bf16 1065369472, %v3175_v46  ;;  %v1409_v33 = vmul.bf16 1056980736, %v1377_v37  ;;  %v1945_v16 = vld [vmem:[%s4899_s4 + $0xc8] sm:$0xff] }
 0x16e   : > { %v1392_v36 = vmul.bf16 1056980736, %v1360_v41  ;;  %v1439_v9 = vmul.bf16 %v1407_v40, %v4107_v25  ;;  %v1423_v25 = vmul.bf16 %v1391_v53, %v4075_v43  ;;  %v3008_v46 = vcombine.low %v1937_v4, %v1945_v16 }
 0x16f   : > { %1691 = vmatpush1.bf16.msra.mxu0 %v1419_v27  ;;  %v1394_v48 = vmul.bf16 1056980736, %v1362_v24  ;;  %v1441_v39 = vmul.bf16 %v1409_v33, %v4127_v35 }
 0x170   : > { %1744 = vmatpush1.bf16.msra.mxu1 %v1421_v28  ;;  %1794 = vmatprep.subr.bf16.mxu0 %v1440_v23  ;;  %v1424_v3 = vmul.bf16 %v1392_v36, %v4134_v2 }
 0x171   : > { %2979 = vmatmul.mubr.msk.bf16.gmra.mxu0 %vm1457_vm2, %v4142_v49  ;;  %1847 = vmatprep.subr.bf16.mxu1 %v1442_v45  ;;  %v1426_v50 = vmul.bf16 %v1394_v48, %v4151_v6  ;;  %v3009_v48 = vcombine.high %v1937_v4, %v1945_v16  ;;  %v4350_v4 = vld [vmem:[%s4899_s4 + $0x90] sm:$0xff] }
 0x172   : > { %2981 = vmatmul.mubr.msk.bf16.gmra.mxu1 %vm1457_vm2, %v4142_v49  ;;  %1708 = vmatprep.mubr.bf16.mxu0 %v4932_v63 }
 0x173   : > { %1761 = vmatprep.mubr.bf16.mxu1 %v4932_v63 }
 0x179   : > { %2982 = vmatmul.mubr.msk.bf16.vlgmr.msra.gmra.mxu0 %vm1457_vm2, %v4065_v32 }
 0x17a   : > { %2984 = vmatmul.mubr.msk.bf16.vlgmr.msra.gmra.mxu1 %vm1457_vm2, %v4065_v32  ;;  %1718 = vmatprep.mubr.bf16.mxu0 %v4932_v63 }
 0x17b   : > { %1771 = vmatprep.mubr.bf16.mxu1 %v4932_v63  ;;  %1795 = vmatpush1.bf16.msra.mxu0 %v1439_v9 }
 0x17c   : > { %1848 = vmatpush1.bf16.msra.mxu1 %v1441_v39  ;;  %1796 = vmatprep.subr.bf16.mxu0 %v1424_v3 }
 0x17d   : > { %1849 = vmatprep.subr.bf16.mxu1 %v1426_v50 }
 0x17f   : > { %1797 = vmatpush1.bf16.msra.mxu0 %v1423_v25 }
 0x180   : > { %1850 = vmatpush1.bf16.msra.mxu1 %v1425_v47 }
 0x181   : > { %2983 = vmatmul.mubr.msk.bf16.gmra.mxu0 %vm1457_vm2, %v4142_v49 }
 0x182   : > { %2985 = vmatmul.mubr.msk.bf16.gmra.mxu1 %vm1457_vm2, %v4142_v49  ;;  %1814 = vmatprep.mubr.bf16.mxu0 %v4932_v63 }
 0x183   : > { %1867 = vmatprep.mubr.bf16.mxu1 %v4932_v63 }
 0x189   : > { %2986 = vmatmul.mubr.msk.bf16.vlgmr.msra.gmra.mxu0 %vm1457_vm2, %v4065_v32 }
 0x18a   : > { %2988 = vmatmul.mubr.msk.bf16.vlgmr.msra.gmra.mxu1 %vm1457_vm2, %v4065_v32  ;;  %1824 = vmatprep.mubr.bf16.mxu0 %v4932_v63  ;;  %v1928_v32 = vld [vmem:[%s4899_s4 + $0x40] sm:$0xff] }
 0x18b   : > { %1877 = vmatprep.mubr.bf16.mxu1 %v4932_v63  ;;  %v2990_v6 = vcombine.low %v1920_v18, %v1928_v32  ;;  %v2991_v14 = vcombine.high %v1920_v18, %v1928_v32 }
 0x191   : > { %2987 = vmatmul.mubr.msk.bf16.gmra.mxu0 %vm1457_vm2, %v4142_v49 }
 0x192   : > { %2989 = vmatmul.mubr.msk.bf16.gmra.mxu1 %vm1457_vm2, %v4142_v49  ;;  %2468 = vmatprep.mubr.bf16.mxu0 %v4932_v63  ;;  %v1921_v49 = vld [vmem:[%s4899_s4 + $0x8] sm:$0xff] }
 0x193   : > { %2509 = vmatprep.mubr.bf16.mxu1 %v4932_v63  ;;  %v2992_v54 = vcombine.low %v1921_v49, %v1929_v5  ;;  %v2993_v57 = vcombine.high %v1921_v49, %v1929_v5 }
 0x205   : > { %v1498_v43 = vpop.f32.mrf.mxu0 }
 0x207   : > { %v1500_v35 = vpop.f32.mrf.mxu0  ;;  %v1551_v2 = vpop.f32.mrf.mxu1 }
 0x209   : > { %v1502_v22 = vpop.f32.mrf.mxu0  ;;  %v1553_v58 = vpop.f32.mrf.mxu1 }
 0x20a   : > { %v1888_v38 = vpack.c.bf16 %v1502_v22, %v1498_v43 }
 0x20b   : > { %v1504_v61 = vpop.f32.mrf.mxu0  ;;  %v1555_v11 = vpop.f32.mrf.mxu1 }
 0x20c   : > { %v4267_v15 = vadd.bf16 %v2990_v6, %v1888_v38  ;;  %v1889_v51 = vpack.c.bf16 %v1504_v61, %v1500_v35  ;;  %v1890_v19 = vpack.c.bf16 %v1555_v11, %v1551_v2 }
 0x20d   : > { %v1508_v44 = vpop.f32.mrf.mxu0  ;;  %v1557_v12 = vpop.f32.mrf.mxu1 }
 0x20e   : > { %v2144_v26 = vmul.bf16 %v4267_v15, %v4267_v15  ;;  %v4277_v30 = vadd.bf16 %v2991_v14, %v1889_v51  ;;  %v4279_v17 = vadd.bf16 %v2992_v54, %v1890_v19  ;;  %v1891_v29 = vpack.c.bf16 %v1557_v12, %v1553_v58 }
 0x20f   : > { %v1510_v62 = vpop.f32.mrf.mxu0  ;;  %v1561_v52 = vpop.f32.mrf.mxu1 }
 0x210   : > { %v2176_v7 = vmul.bf16 %v2144_v26, %v4267_v15  ;;  %v2145_v56 = vmul.bf16 %v4277_v30, %v4277_v30  ;;  %v2146_v21 = vmul.bf16 %v4279_v17, %v4279_v17  ;;  %v4292_v13 = vadd.bf16 %v2993_v57, %v1891_v29 }
 0x211   : > { %v1512_v1 = vpop.f32.mrf.mxu0  ;;  %v1563_v27 = vpop.f32.mrf.mxu1 }
 0x212   : > { %v2208_v23 = vmul.bf16 1027030327, %v2176_v7  ;;  %v2177_v10 = vmul.bf16 %v2145_v56, %v4277_v30  ;;  %v1904_v45 = vpack.c.bf16 %v1512_v1, %v1508_v44  ;;  %v2178_v28 = vmul.bf16 %v2146_v21, %v4279_v17  ;;  %v4330_v7 = vld [vmem:[%s4899_s4 + $0x10] sm:$0xff]  ;;  %v4360_v1 = vld [vmem:[%s4899_s4 + $0x98] sm:$0xff] }
 0x213   : > { %v2147_v42 = vmul.bf16 %v4292_v13, %v4292_v13  ;;  %v1514_v59 = vpop.f32.mrf.mxu0  ;;  %v1565_v40 = vpop.f32.mrf.mxu1  ;;  %v4335_v56 = vld [vmem:[%s4899_s4 + $0x50] sm:$0xff] }
 0x214   : > { %v2240_v37 = vadd.bf16 %v2208_v23, %v4267_v15  ;;  %v2209_v41 = vmul.bf16 1027030327, %v2177_v10  ;;  %v4299_v24 = vadd.bf16 %v3006_v34, %v1904_v45  ;;  %v1905_v20 = vpack.c.bf16 %v1514_v59, %v1510_v62  ;;  %v4345_v34 = vld [vmem:[%s4899_s4 + $0x58] sm:$0xff]  ;;  %v4355_v21 = vld [vmem:[%s4899_s4 + $0xd0] sm:$0xff]  ;;  %v4370_v10 = vld [vmem:[%s4899_s4 + $0x20] sm:$0xff] }
 0x215   : > { %v2210_v33 = vmul.bf16 1027030327, %v2178_v28  ;;  %v2179_v36 = vmul.bf16 %v2147_v42, %v4292_v13  ;;  %v1906_v31 = vpack.c.bf16 %v1565_v40, %v1561_v52  ;;  %v1567_v55 = vpop.f32.mrf.mxu1  ;;  %v4340_v52 = vld [vmem:[%s4899_s4 + $0x18] sm:$0xff]  ;;  %v4380_v45 = vld [vmem:[%s4899_s4 + $0x28] sm:$0xff]  ;;  %v2994_v28 = vcombine.low %v4330_v7, %v4335_v56  ;;  %v4394_v59 = vld [vmem:[%s4899_s4 + $0xa0] sm:$0xff] }
 0x216   : > { %v2272_v9 = vmul.bf16 1061961548, %v2240_v37  ;;  %v2241_v53 = vadd.bf16 %v2209_v41, %v4277_v30  ;;  %v2160_v39 = vmul.bf16 %v4299_v24, %v4299_v24  ;;  %v4305_v3 = vadd.bf16 %v3007_v0, %v1905_v20  ;;  %v4365_v23 = vld [vmem:[%s4899_s4 + $0xd8] sm:$0xff]  ;;  %v4399_v37 = vld [vmem:[%s4899_s4 + $0xe0] sm:$0xff] }
 0x217   : > { %v2242_v50 = vadd.bf16 %v2210_v33, %v4279_v17  ;;  %v2211_v25 = vmul.bf16 1027030327, %v2179_v36  ;;  %v4308_v47 = vadd.bf16 %v3008_v46, %v1906_v31  ;;  %v1907_v43 = vpack.c.bf16 %v1567_v55, %v1563_v27  ;;  %v4375_v27 = vld [vmem:[%s4899_s4 + $0x60] sm:$0xff]  ;;  %v4389_v46 = vld [vmem:[%s4899_s4 + $0x68] sm:$0xff] }
 0x218   : > { %3176 = vtanh.bf16 %v2272_v9  ;;  %v2192_v18 = vmul.bf16 %v2160_v39, %v4299_v24  ;;  %v2161_v32 = vmul.bf16 %v4305_v3, %v4305_v3  ;;  %v2273_v35 = vmul.bf16 1061961548, %v2241_v53  ;;  %v4412_v9 = vld [vmem:[%s4899_s4 + $0xa8] sm:$0xff]  ;;  %v4422_v39 = vld [vmem:[%s4899_s4 + $0x30] sm:$0xff] }
 0x219   : > { %v2274_v2 = vmul.bf16 1061961548, %v2242_v50  ;;  %v2243_v6 = vadd.bf16 %v2211_v25, %v4292_v13  ;;  %v2162_v49 = vmul.bf16 %v4308_v47, %v4308_v47  ;;  %v4316_v5 = vadd.bf16 %v3009_v48, %v1907_v43  ;;  %v4417_v53 = vld [vmem:[%s4899_s4 + $0xe8] sm:$0xff] }
 0x21a   : > { %v2224_v22 = vmul.bf16 1027030327, %v2192_v18  ;;  %v2193_v58 = vmul.bf16 %v2161_v32, %v4305_v3  ;;  %3178 = vtanh.bf16 %v2273_v35  ;;  %v2996_v42 = vcombine.low %v4340_v52, %v4345_v34  ;;  %v4433_v18 = vld [vmem:[%s4899_s4 + $0x70] sm:$0xff]  ;;  %v4438_v32 = vld [vmem:[%s4899_s4 + $0x38] sm:$0xff] }
 0x21b   : > { %3180 = vtanh.bf16 %v2274_v2  ;;  %v2194_v38 = vmul.bf16 %v2162_v49, %v4308_v47  ;;  %v2163_v14 = vmul.bf16 %v4316_v5, %v4316_v5  ;;  %v2275_v54 = vmul.bf16 1061961548, %v2243_v6  ;;  %v4443_v35 = vld [vmem:[%s4899_s4 + $0x78] sm:$0xff] }
 0x21c   : > { %v2256_v61 = vadd.bf16 %v2224_v22, %v4299_v24  ;;  %v2225_v11 = vmul.bf16 1027030327, %v2193_v58  ;;  %v2995_v33 = vcombine.high %v4330_v7, %v4335_v56  ;;  %v2997_v36 = vcombine.high %v4340_v52, %v4345_v34 }
 0x21d   : > { %v2226_v51 = vmul.bf16 1027030327, %v2194_v38  ;;  %v2195_v19 = vmul.bf16 %v2163_v14, %v4316_v5  ;;  %3182 = vtanh.bf16 %v2275_v54  ;;  %v3010_v31 = vcombine.low %v4350_v4, %v4355_v21  ;;  %v4456_v14 = vld [vmem:[%s4899_s4 + $0xb0] sm:$0xff] }
 0x21e   : > { %v2288_v57 = vmul.bf16 1061961548, %v2256_v61  ;;  %v2257_v44 = vadd.bf16 %v2225_v11, %v4305_v3  ;;  %v4461_v54 = vld [vmem:[%s4899_s4 + $0xf0] sm:$0xff] }
 0x21f   : > { %v2258_v60 = vadd.bf16 %v2226_v51, %v4308_v47  ;;  %v2227_v8 = vmul.bf16 1027030327, %v2195_v19 }
 0x220   : > { %3184 = vtanh.bf16 %v2288_v57  ;;  %v2289_v26 = vmul.bf16 1061961548, %v2257_v44 }
 0x221   : > { %v2290_v12 = vmul.bf16 1061961548, %v2258_v60  ;;  %v2259_v29 = vadd.bf16 %v2227_v8, %v4316_v5  ;;  %v4472_v60 = vld [vmem:[%s4899_s4 + $0xb8] sm:$0xff] }
 0x222   : > { %3186 = vtanh.bf16 %v2289_v26  ;;  %v4477_v8 = vld [vmem:[%s4899_s4 + $0xf8] sm:$0xff] }
 0x223   : > { %3188 = vtanh.bf16 %v2290_v12  ;;  %v2291_v62 = vmul.bf16 1061961548, %v2259_v29 }
 0x225   : > { %3190 = vtanh.bf16 %v2291_v62 }
 0x226   : > { %v3177_v16 = vpop.eup %3176 }
 0x227   : > { %v2336_v41 = vadd.bf16 1065369472, %v3177_v16 }
 0x228   : > { %v3179_v0 = vpop.eup %3178 }
 0x229   : > { %v3181_v40 = vpop.eup %3180  ;;  %v1604_v20 = vpop.f32.mrf.mxu0  ;;  %v2337_v2 = vadd.bf16 1065369472, %v3179_v0  ;;  %v4467_v57 = vmul.bf16 1056980736, %v2336_v41 }
 0x22a   : > { %v1657_v55 = vpop.f32.mrf.mxu1  ;;  %v2338_v44 = vadd.bf16 1065369472, %v3181_v40 }
 0x22b   : > { %v1606_v6 = vpop.f32.mrf.mxu0  ;;  %v3183_v61 = vpop.eup %3182  ;;  %v4487_v41 = vmul.bf16 1056980736, %v2337_v2 }
 0x22c   : > { %v1659_v11 = vpop.f32.mrf.mxu1  ;;  %v2339_v38 = vadd.bf16 1065369472, %v3183_v61  ;;  %v4499_v22 = vmul.bf16 1056980736, %v2338_v44 }
 0x22d   : > { %v1608_v26 = vpop.f32.mrf.mxu0 }
 0x22e   : > { %v3185_v56 = vpop.eup %3184  ;;  %v1892_v16 = vpack.c.bf16 %v1608_v26, %v1604_v20  ;;  %v1661_v0 = vpop.f32.mrf.mxu1 }
 0x22f   : > { %v1894_v19 = vpack.c.bf16 %v1661_v0, %v1657_v55  ;;  %v1610_v51 = vpop.f32.mrf.mxu0  ;;  %v2352_v29 = vadd.bf16 1065369472, %v3185_v56 }
 0x230   : > { %v3187_v58 = vpop.eup %3186  ;;  %v4495_v7 = vadd.bf16 %v2994_v28, %v1892_v16  ;;  %v1893_v20 = vpack.c.bf16 %v1610_v51, %v1606_v6  ;;  %v1663_v26 = vpop.f32.mrf.mxu1  ;;  %v2401_v51 = vmul.bf16 %v4487_v41, %v4277_v30 }
 0x231   : > { %v3189_v40 = vpop.eup %3188  ;;  %v4501_v49 = vadd.bf16 %v2996_v42, %v1894_v19  ;;  %v1895_v55 = vpack.c.bf16 %v1663_v26, %v1659_v11  ;;  %v1614_v0 = vpop.f32.mrf.mxu0  ;;  %v2353_v56 = vadd.bf16 1065369472, %v3187_v58  ;;  %v2384_v61 = vmul.bf16 1056980736, %v2352_v29 }
 0x232   : > { %v2148_v62 = vmul.bf16 %v4495_v7, %v4495_v7  ;;  %v4505_v12 = vadd.bf16 %v2995_v33, %v1893_v20  ;;  %v1667_v28 = vpop.f32.mrf.mxu1  ;;  %v2354_v6 = vadd.bf16 1065369472, %v3189_v40  ;;  %v4516_v19 = vmul.bf16 1056980736, %v2339_v38 }
 0x233   : > { %v3191_v16 = vpop.eup %3190  ;;  %v2150_v44 = vmul.bf16 %v4501_v49, %v4501_v49  ;;  %v4514_v42 = vadd.bf16 %v2997_v36, %v1895_v55  ;;  %v1616_v58 = vpop.f32.mrf.mxu0  ;;  %v2385_v11 = vmul.bf16 1056980736, %v2353_v56  ;;  %v2416_v38 = vmul.bf16 %v2384_v61, %v4299_v24 }
 0x234   : > { %v2180_v33 = vmul.bf16 %v2148_v62, %v4495_v7  ;;  %v2149_v29 = vmul.bf16 %v4505_v12, %v4505_v12  ;;  %v1669_v40 = vpop.f32.mrf.mxu1  ;;  %v2355_v30 = vadd.bf16 1065369472, %v3191_v16  ;;  %v2386_v43 = vmul.bf16 1056980736, %v2354_v6 }
 0x235   : > { %v2182_v20 = vmul.bf16 %v2150_v44, %v4501_v49  ;;  %v2151_v52 = vmul.bf16 %v4514_v42, %v4514_v42  ;;  %v1618_v34 = vpop.f32.mrf.mxu0  ;;  %v2417_v36 = vmul.bf16 %v2385_v11, %v4305_v3 }
 0x236   : > { %v2212_v26 = vmul.bf16 1027030327, %v2180_v33  ;;  %v2181_v62 = vmul.bf16 %v2149_v29, %v4505_v12  ;;  %v1908_v55 = vpack.c.bf16 %v1618_v34, %v1614_v0  ;;  %v1671_v56 = vpop.f32.mrf.mxu1  ;;  %v2387_v44 = vmul.bf16 1056980736, %v2355_v30 }
 0x237   : > { %v2214_v16 = vmul.bf16 1027030327, %v2182_v20  ;;  %v2183_v2 = vmul.bf16 %v2151_v52, %v4514_v42  ;;  %v1910_v41 = vpack.c.bf16 %v1671_v56, %v1667_v28  ;;  %v1620_v25 = vpop.f32.mrf.mxu0  ;;  %2448 = vmatprep.subr.bf16.mxu0 %v2417_v36  ;;  %v4943_v28 = vcombine.low %v4360_v1, %v4365_v23 }
 0x238   : > { %v2244_v50 = vadd.bf16 %v2212_v26, %v4495_v7  ;;  %v2213_v48 = vmul.bf16 1027030327, %v2181_v62  ;;  %v4534_v24 = vadd.bf16 %v3010_v31, %v1908_v55  ;;  %v1909_v3 = vpack.c.bf16 %v1620_v25, %v1616_v58  ;;  %v1673_v61 = vpop.f32.mrf.mxu1  ;;  %2449 = vmatpush1.bf16.msra.mxu0 %v2416_v38 }
 0x239   : > { %v2246_v0 = vadd.bf16 %v2214_v16, %v4501_v49  ;;  %v2215_v6 = vmul.bf16 1027030327, %v2183_v2  ;;  %v4540_v11 = vadd.bf16 %v4943_v28, %v1910_v41  ;;  %v1911_v33 = vpack.c.bf16 %v1673_v61, %v1669_v40  ;;  %v1710_v29 = vpop.f32.mrf.mxu0  ;;  %2450 = vmatprep.subr.bf16.mxu0 %v2401_v51 }
 0x23a   : > { %v2276_v30 = vmul.bf16 1061961548, %v2244_v50  ;;  %v2164_v20 = vmul.bf16 %v4534_v24, %v4534_v24  ;;  %v4944_v31 = vcombine.high %v4350_v4, %v4355_v21  ;;  %v1763_v58 = vpop.f32.mrf.mxu1  ;;  %v2403_v2 = vmul.bf16 %v4516_v19, %v4292_v13 }
 0x23b   : > { %v2278_v52 = vmul.bf16 1061961548, %v2246_v0  ;;  %v2245_v41 = vadd.bf16 %v2213_v48, %v4505_v12  ;;  %v2166_v40 = vmul.bf16 %v4540_v11, %v4540_v11  ;;  %v4945_v50 = vcombine.high %v4360_v1, %v4365_v23  ;;  %v1712_v34 = vpop.f32.mrf.mxu0  ;;  %v4570_v1 = vld [vmem:[%s4900_s5] sm:$0x3] }
 0x23c   : > { %v4547_v25 = vadd.bf16 %v4944_v31, %v1909_v3  ;;  %v2196_v4 = vmul.bf16 %v2164_v20, %v4534_v24  ;;  %v1765_v36 = vpop.f32.mrf.mxu1  ;;  %v2419_v13 = vmul.bf16 %v2387_v44, %v4316_v5  ;;  %v2418_v19 = vmul.bf16 %v2386_v43, %v4308_v47 }
 0x23d   : > { %v4557_v51 = vadd.bf16 %v4945_v50, %v1911_v33  ;;  %v4946_v48 = vmul.bf16 %v4467_v57, %v4267_v15  ;;  %3192 = vtanh.bf16 %v2276_v30  ;;  %v4573_v23 = vadd.bf16 %v2215_v6, %v4514_v42  ;;  %v1714_v26 = vpop.f32.mrf.mxu0 }
 0x23e   : > { %v2165_v21 = vmul.bf16 %v4547_v25, %v4547_v25  ;;  %v2198_v38 = vmul.bf16 %v2166_v40, %v4540_v11  ;;  %3194 = vtanh.bf16 %v2278_v52  ;;  %v2228_v47 = vmul.bf16 1027030327, %v2196_v4  ;;  %v1767_v57 = vpop.f32.mrf.mxu1  ;;  %2489 = vmatprep.subr.bf16.mxu1 %v2419_v13 }
 0x23f   : > { %2451 = vmatpush1.bf16.msra.mxu0 %v4946_v48  ;;  %v2167_v5 = vmul.bf16 %v4557_v51, %v4557_v51  ;;  %v1896_v43 = vpack.c.bf16 %v1714_v26, %v1710_v29  ;;  %v1898_v56 = vpack.c.bf16 %v1767_v57, %v1763_v58  ;;  %v1716_v16 = vpop.f32.mrf.mxu0  ;;  %2490 = vmatpush1.bf16.msra.mxu1 %v2418_v19  ;;  %v2277_v44 = vmul.bf16 1061961548, %v2245_v41 }
 0x240   : > { %v2197_v15 = vmul.bf16 %v2165_v21, %v4547_v25  ;;  %v2230_v62 = vmul.bf16 1027030327, %v2198_v38  ;;  %v2260_v3 = vadd.bf16 %v2228_v47, %v4534_v24  ;;  %v4947_v0 = vcombine.low %v4370_v10, %v4375_v27  ;;  %v1769_v33 = vpop.f32.mrf.mxu1  ;;  %2491 = vmatprep.subr.bf16.mxu1 %v2403_v2 }
 0x241   : > { %v2199_v55 = vmul.bf16 %v2167_v5, %v4557_v51  ;;  %v1897_v28 = vpack.c.bf16 %v1716_v16, %v1712_v34  ;;  %v4948_v20 = vcombine.low %v4380_v45, %v4389_v46  ;;  %v1899_v58 = vpack.c.bf16 %v1769_v33, %v1765_v36  ;;  %v1720_v52 = vpop.f32.mrf.mxu0 }
 0x242   : > { %3022 = vmatmul.mubr.msk.bf16.vlgmr.msra.gmra.mxu0 %vm1457_vm2, %v4570_v1  ;;  %v2229_v61 = vmul.bf16 1027030327, %v2197_v15  ;;  %v4586_v6 = vadd.bf16 %v4947_v0, %v1896_v43  ;;  %v2262_v29 = vadd.bf16 %v2230_v62, %v4540_v11  ;;  %v2292_v41 = vmul.bf16 1061961548, %v2260_v3  ;;  %v1773_v4 = vpop.f32.mrf.mxu1 }
 0x243   : > { %2550 = vmatprep.mubr.bf16.mxu0 %v4932_v63  ;;  %v2231_v30 = vmul.bf16 1027030327, %v2199_v55  ;;  %v4593_v31 = vadd.bf16 %v4948_v20, %v1898_v56  ;;  %v4949_v2 = vcombine.high %v4370_v10, %v4375_v27  ;;  %v4950_v36 = vcombine.high %v4380_v45, %v4389_v46  ;;  %v1722_v48 = vpop.f32.mrf.mxu0 }
 0x244   : > { %v2261_v40 = vadd.bf16 %v2229_v61, %v4547_v25  ;;  %v2152_v50 = vmul.bf16 %v4586_v6, %v4586_v6  ;;  %v4951_v38 = vmul.bf16 %v4499_v22, %v4279_v17  ;;  %3196 = vtanh.bf16 %v2277_v44  ;;  %v1775_v26 = vpop.f32.mrf.mxu1 }
 0x245   : > { %v4601_v34 = vadd.bf16 %v4949_v2, %v1897_v28  ;;  %v2263_v21 = vadd.bf16 %v2231_v30, %v4557_v51  ;;  %v2154_v13 = vmul.bf16 %v4593_v31, %v4593_v31  ;;  %v4609_v19 = vadd.bf16 %v4950_v36, %v1899_v58  ;;  %v1724_v46 = vpop.f32.mrf.mxu0 }
 0x246   : > { %2492 = vmatpush1.bf16.msra.mxu1 %v4951_v38  ;;  %v2294_v10 = vmul.bf16 1061961548, %v2262_v29  ;;  %v2184_v27 = vmul.bf16 %v2152_v50, %v4586_v6  ;;  %v2293_v47 = vmul.bf16 1061961548, %v2261_v40  ;;  %3198 = vtanh.bf16 %v2292_v41  ;;  %v1777_v62 = vpop.f32.mrf.mxu1 }
 0x247   : > { %v2153_v5 = vmul.bf16 %v4601_v34, %v4601_v34  ;;  %v2186_v15 = vmul.bf16 %v2154_v13, %v4593_v31  ;;  %v2155_v45 = vmul.bf16 %v4609_v19, %v4609_v19  ;;  %v2295_v43 = vmul.bf16 1061961548, %v2263_v21  ;;  %v1726_v44 = vpop.f32.mrf.mxu0 }
 0x248   : > { %v2216_v57 = vmul.bf16 1027030327, %v2184_v27  ;;  %v1912_v22 = vpack.c.bf16 %v1724_v46, %v1720_v52  ;;  %3200 = vtanh.bf16 %v2293_v47  ;;  %v1914_v16 = vpack.c.bf16 %v1777_v62, %v1773_v4  ;;  %v1779_v29 = vpop.f32.mrf.mxu1 }
 0x249   : > { %v2185_v17 = vmul.bf16 %v2153_v5, %v4601_v34  ;;  %3023 = vmatmul.mubr.msk.bf16.vlgmr.msra.gmra.mxu1 %vm1457_vm2, %v4570_v1  ;;  %v2218_v55 = vmul.bf16 1027030327, %v2186_v15  ;;  %v2187_v56 = vmul.bf16 %v2155_v45, %v4609_v19  ;;  %3202 = vtanh.bf16 %v2295_v43  ;;  %v1816_v40 = vpop.f32.mrf.mxu0 }
 0x24a   : > { %2591 = vmatprep.mubr.bf16.mxu1 %v4932_v63  ;;  %v2248_v3 = vadd.bf16 %v2216_v57, %v4586_v6  ;;  %v4952_v0 = vcombine.low %v4394_v59, %v4399_v37  ;;  %v1913_v33 = vpack.c.bf16 %v1726_v44, %v1722_v48  ;;  %v4953_v58 = vcombine.low %v4412_v9, %v4417_v53  ;;  %v1869_v13 = vpop.f32.mrf.mxu1 }
 0x24b   : > { %v2217_v61 = vmul.bf16 1027030327, %v2185_v17  ;;  %v2250_v30 = vadd.bf16 %v2218_v55, %v4593_v31  ;;  %v2219_v20 = vmul.bf16 1027030327, %v2187_v56  ;;  %v1915_v41 = vpack.c.bf16 %v1779_v29, %v1775_v26  ;;  %v4646_v48 = vpop.eup %3192  ;;  %v1818_v26 = vpop.f32.mrf.mxu0 }
 0x24c   : > { %v4629_v28 = vadd.bf16 %v4952_v0, %v1912_v22  ;;  %v4635_v52 = vadd.bf16 %v4953_v58, %v1914_v16  ;;  %v2280_v50 = vmul.bf16 1061961548, %v2248_v3  ;;  %v4954_v4 = vcombine.high %v4394_v59, %v4399_v37  ;;  %v4658_v47 = vpop.eup %3194 }
 0x24d   : > { %v3019_v36 = vcombine.high %v4456_v14, %v4461_v54  ;;  %v4955_v27 = vcombine.high %v4412_v9, %v4417_v53  ;;  %v3021_v59 = vcombine.high %v4472_v60, %v4477_v8  ;;  %v2279_v37 = vmul.bf16 1061961548, %v4573_v23  ;;  %v1871_v9 = vpop.f32.mrf.mxu1  ;;  %v1820_v17 = vpop.f32.mrf.mxu0 }
 0x24e   : > { %v2168_v2 = vmul.bf16 %v4629_v28, %v4629_v28  ;;  %v4642_v21 = vadd.bf16 %v4954_v4, %v1913_v33  ;;  %v2170_v38 = vmul.bf16 %v4635_v52, %v4635_v52  ;;  %3204 = vtanh.bf16 %v2294_v10 }
 0x24f   : > { %v4653_v5 = vadd.bf16 %v4955_v27, %v1915_v41  ;;  %v4661_v15 = vadd.bf16 %v2217_v61, %v4601_v34  ;;  %v2282_v53 = vmul.bf16 1061961548, %v2250_v30  ;;  %v4667_v43 = vadd.bf16 %v2219_v20, %v4609_v19  ;;  %v1873_v55 = vpop.f32.mrf.mxu1  ;;  %v1822_v3 = vpop.f32.mrf.mxu0 }
 0x250   : > { %v2200_v45 = vmul.bf16 %v2168_v2, %v4629_v28  ;;  %v2169_v46 = vmul.bf16 %v4642_v21, %v4642_v21  ;;  %v2202_v57 = vmul.bf16 %v2170_v38, %v4635_v52  ;;  %3206 = vtanh.bf16 %v2280_v50 }
 0x251   : > { %v2171_v23 = vmul.bf16 %v4653_v5, %v4653_v5  ;;  %v1900_v62 = vpack.c.bf16 %v1820_v17, %v1816_v40  ;;  %v1902_v44 = vpack.c.bf16 %v1873_v55, %v1869_v13  ;;  %3208 = vtanh.bf16 %v2279_v37  ;;  %v1875_v20 = vpop.f32.mrf.mxu1  ;;  %v1826_v4 = vpop.f32.mrf.mxu0 }
 0x252   : > { %v2232_v10 = vmul.bf16 1027030327, %v2200_v45  ;;  %v2201_v22 = vmul.bf16 %v2169_v46, %v4642_v21  ;;  %v2234_v56 = vmul.bf16 1027030327, %v2202_v57  ;;  %v4956_v33 = vcombine.low %v4422_v39, %v4433_v18  ;;  %v4680_v58 = vpop.eup %3196 }
 0x253   : > { %v2203_v16 = vmul.bf16 %v2171_v23, %v4653_v5  ;;  %v1901_v30 = vpack.c.bf16 %v1822_v3, %v1818_v26  ;;  %v4957_v40 = vcombine.low %v4438_v32, %v4443_v35  ;;  %v1903_v2 = vpack.c.bf16 %v1875_v20, %v1871_v9  ;;  %v1879_v46 = vpop.f32.mrf.mxu1 }
 0x254   : > { %v2264_v61 = vadd.bf16 %v2232_v10, %v4629_v28  ;;  %v2233_v0 = vmul.bf16 1027030327, %v2201_v22  ;;  %v4678_v29 = vadd.bf16 %v4956_v33, %v1900_v62  ;;  %v2266_v41 = vadd.bf16 %v2234_v56, %v4635_v52  ;;  %v3199_v57 = vpop.eup %3198  ;;  %v1828_v10 = vpop.f32.mrf.mxu0 }
 0x255   : > { %v4686_v50 = vadd.bf16 %v4957_v40, %v1902_v44  ;;  %v2340_v13 = vadd.bf16 1065369472, %v4646_v48  ;;  %v2235_v27 = vmul.bf16 1027030327, %v2203_v16  ;;  %v4958_v26 = vcombine.high %v4422_v39, %v4433_v18 }
 0x256   : > { %v2296_v38 = vmul.bf16 1061961548, %v2264_v61  ;;  %v2156_v37 = vmul.bf16 %v4678_v29, %v4678_v29  ;;  %3210 = vtanh.bf16 %v2282_v53  ;;  %v4959_v9 = vcombine.high %v4438_v32, %v4443_v35  ;;  %v3201_v62 = vpop.eup %3200  ;;  %v1881_v53 = vpop.f32.mrf.mxu1 }
 0x257   : > { %v4694_v45 = vadd.bf16 %v4958_v26, %v1901_v30  ;;  %v2158_v23 = vmul.bf16 %v4686_v50, %v4686_v50  ;;  %v2342_v22 = vadd.bf16 1065369472, %v4658_v47  ;;  %v4705_v55 = vadd.bf16 %v2233_v0, %v4642_v21  ;;  %v3203_v16 = vpop.eup %3202  ;;  %v1830_v3 = vpop.f32.mrf.mxu0 }
 0x258   : > { %v4701_v17 = vadd.bf16 %v4959_v9, %v1903_v2  ;;  %v2188_v39 = vmul.bf16 %v2156_v37, %v4678_v29  ;;  %v2341_v56 = vadd.bf16 1065369472, %v4680_v58  ;;  %v2298_v44 = vmul.bf16 1061961548, %v2266_v41  ;;  %v1883_v20 = vpop.f32.mrf.mxu1 }
 0x259   : > { %v2157_v18 = vmul.bf16 %v4694_v45, %v4694_v45  ;;  %v2190_v32 = vmul.bf16 %v2158_v23, %v4686_v50  ;;  %v2357_v61 = vadd.bf16 1065369472, %v3201_v62  ;;  %3212 = vtanh.bf16 %v2296_v38  ;;  %v1832_v37 = vpop.f32.mrf.mxu0 }
 0x25a   : > { %v2159_v35 = vmul.bf16 %v4701_v17, %v4701_v17  ;;  %v4715_v0 = vadd.bf16 %v2235_v27, %v4653_v5  ;;  %v2220_v33 = vmul.bf16 1027030327, %v2188_v39  ;;  %v1916_v30 = vpack.c.bf16 %v1830_v3, %v1826_v4  ;;  %v1885_v9 = vpop.f32.mrf.mxu1 }
 0x25b   : > { %v2222_v40 = vmul.bf16 1027030327, %v2190_v32  ;;  %v4718_v2 = vmul.bf16 %v2157_v18, %v4694_v45  ;;  %v1918_v41 = vpack.c.bf16 %v1883_v20, %v1879_v46  ;;  %v4960_v38 = vcombine.low %v4456_v14, %v4461_v54 }
 0x25c   : > { %v4721_v58 = vmul.bf16 %v2159_v35, %v4701_v17  ;;  %v2252_v26 = vadd.bf16 %v2220_v33, %v4678_v29  ;;  %v1917_v27 = vpack.c.bf16 %v1832_v37, %v1828_v10  ;;  %v2389_v4 = vmul.bf16 1056980736, %v2357_v61  ;;  %v3205_v46 = vpop.eup %3204 }
 0x25d   : > { %v4727_v23 = vadd.bf16 %v4960_v38, %v1916_v30  ;;  %v4961_v62 = vcombine.low %v4472_v60, %v4477_v8  ;;  %v1919_v18 = vpack.c.bf16 %v1885_v9, %v1881_v53  ;;  %v2359_v32 = vadd.bf16 1065369472, %v3203_v16 }
 0x25e   : > { %v2356_v35 = vadd.bf16 1065369472, %v3199_v57  ;;  %3214 = vtanh.bf16 %v2298_v44  ;;  %v2284_v3 = vmul.bf16 1061961548, %v2252_v26  ;;  %v4739_v10 = vadd.bf16 %v3019_v36, %v1917_v27  ;;  %v4752_v16 = vpop.eup %3206 }
 0x25f   : > { %v4732_v39 = vadd.bf16 %v4961_v62, %v1918_v41  ;;  %v2172_v33 = vmul.bf16 %v4727_v23, %v4727_v23  ;;  %v4742_v61 = vadd.bf16 %v2222_v40, %v4686_v50  ;;  %v2221_v30 = vmul.bf16 1027030327, %v4718_v2  ;;  %v3209_v20 = vpop.eup %3208 }
 0x260   : > { %v4750_v57 = vadd.bf16 %v3021_v59, %v1919_v18  ;;  %v2223_v44 = vmul.bf16 1027030327, %v4721_v58  ;;  %v2173_v54 = vmul.bf16 %v4739_v10, %v4739_v10  ;;  %v2421_v36 = vmul.bf16 %v2389_v4, %v4547_v25 }
 0x261   : > { %v2174_v53 = vmul.bf16 %v4732_v39, %v4732_v39  ;;  %v2204_v14 = vmul.bf16 %v2172_v33, %v4727_v23  ;;  %3216 = vtanh.bf16 %v2284_v3  ;;  %v2391_v8 = vmul.bf16 1056980736, %v2359_v32 }
 0x262   : > { %v2175_v60 = vmul.bf16 %v4750_v57, %v4750_v57  ;;  %v2205_v2 = vmul.bf16 %v2173_v54, %v4739_v10  ;;  %2530 = vmatprep.subr.bf16.mxu0 %v2421_v36  ;;  %v2388_v58 = vmul.bf16 1056980736, %v2356_v35  ;;  %v2358_v41 = vadd.bf16 1065369472, %v3205_v46 }
 0x263   : > { %v2206_v40 = vmul.bf16 %v2174_v53, %v4732_v39  ;;  %v2236_v59 = vmul.bf16 1027030327, %v2204_v14  ;;  %v2423_v38 = vmul.bf16 %v2391_v8, %v4557_v51  ;;  %v2373_v25 = vmul.bf16 1056980736, %v2341_v56 }
 0x264   : > { %v2207_v26 = vmul.bf16 %v2175_v60, %v4750_v57  ;;  %v2237_v9 = vmul.bf16 1027030327, %v2205_v2  ;;  %v2420_v4 = vmul.bf16 %v2388_v58, %v4534_v24  ;;  %v2390_v62 = vmul.bf16 1056980736, %v2358_v41  ;;  %v4767_v18 = vpop.eup %3210 }
 0x265   : > { %v2238_v37 = vmul.bf16 1027030327, %v2206_v40  ;;  %v2268_v27 = vadd.bf16 %v2236_v59, %v4727_v23  ;;  %2571 = vmatprep.subr.bf16.mxu1 %v2423_v38  ;;  %v2405_v35 = vmul.bf16 %v2373_v25, %v4505_v12  ;;  %v2343_v46 = vadd.bf16 1065369472, %v3209_v20 }
 0x266   : > { %v2239_v3 = vmul.bf16 1027030327, %v2207_v26  ;;  %v2269_v53 = vadd.bf16 %v2237_v9, %v4739_v10  ;;  %2531 = vmatpush1.bf16.msra.mxu0 %v2420_v4  ;;  %v2422_v51 = vmul.bf16 %v2390_v62, %v4540_v11  ;;  %v2372_v56 = vmul.bf16 1056980736, %v2340_v13 }
 0x267   : > { %v2270_v32 = vadd.bf16 %v2238_v37, %v4732_v39  ;;  %v2300_v33 = vmul.bf16 1061961548, %v2268_v27  ;;  %2532 = vmatprep.subr.bf16.mxu0 %v2405_v35  ;;  %v2375_v54 = vmul.bf16 1056980736, %v2343_v46  ;;  %v2374_v36 = vmul.bf16 1056980736, %v2342_v22  ;;  %v3213_v40 = vpop.eup %3212 }
 0x268   : > { %v2271_v14 = vadd.bf16 %v2239_v3, %v4750_v57  ;;  %2572 = vmatpush1.bf16.msra.mxu1 %v2422_v51  ;;  %v2404_v12 = vmul.bf16 %v2372_v56, %v4495_v7  ;;  %v2297_v20 = vmul.bf16 1061961548, %v4705_v55  ;;  %v2299_v11 = vmul.bf16 1061961548, %v4715_v0 }
 0x269   : > { %v2302_v24 = vmul.bf16 1061961548, %v2270_v32  ;;  %3218 = vtanh.bf16 %v2300_v33  ;;  %v2253_v48 = vadd.bf16 %v2221_v30, %v4694_v45  ;;  %v2255_v13 = vadd.bf16 %v2223_v44, %v4701_v17 }
 0x26a   : > { %v2407_v60 = vmul.bf16 %v2375_v54, %v4514_v42  ;;  %2533 = vmatpush1.bf16.msra.mxu0 %v2404_v12  ;;  %v2406_v47 = vmul.bf16 %v2374_v36, %v4501_v49  ;;  %v2281_v22 = vmul.bf16 1061961548, %v4661_v15  ;;  %v2283_v8 = vmul.bf16 1061961548, %v4667_v43 }
 0x26b   : > { %3220 = vtanh.bf16 %v2302_v24  ;;  %v2301_v55 = vmul.bf16 1061961548, %v2269_v53  ;;  %v2303_v0 = vmul.bf16 1061961548, %v2271_v14  ;;  %v2286_v42 = vmul.bf16 1061961548, %v4742_v61 }
 0x26c   : > { %3222 = vtanh.bf16 %v2297_v20  ;;  %2573 = vmatprep.subr.bf16.mxu1 %v2407_v60  ;;  %v3215_v7 = vpop.eup %3214  ;;  %v2285_v49 = vmul.bf16 1061961548, %v2253_v48  ;;  %v2287_v15 = vmul.bf16 1061961548, %v2255_v13  ;;  %v2360_v43 = vadd.bf16 1065369472, %v3213_v40 }
 0x26d   : > { %3224 = vtanh.bf16 %v2299_v11  ;;  %2574 = vmatpush1.bf16.msra.mxu1 %v2406_v47  ;;  %3024 = vmatmul.mubr.msk.bf16.vlgmr.msra.gmra.mxu0 %vm1457_vm2, %v4570_v1  ;;  %v2362_v44 = vadd.bf16 1065369472, %v3215_v7  ;;  %v2344_v2 = vadd.bf16 1065369472, %v4752_v16  ;;  %v2346_v37 = vadd.bf16 1065369472, %v4767_v18 }
 0x26e   : > { %3226 = vtanh.bf16 %v2281_v22  ;;  %2632 = vmatprep.mubr.bf16.mxu0 %v4932_v63  ;;  %v2392_v41 = vmul.bf16 1056980736, %v2360_v43 }
 0x26f   : > { %3228 = vtanh.bf16 %v2283_v8  ;;  %v4791_v30 = vpop.eup %3216  ;;  %v2394_v25 = vmul.bf16 1056980736, %v2362_v44  ;;  %v2376_v3 = vmul.bf16 1056980736, %v2344_v2  ;;  %v2378_v51 = vmul.bf16 1056980736, %v2346_v37 }
 0x270   : > { %3230 = vtanh.bf16 %v2301_v55  ;;  %3025 = vmatmul.mubr.msk.bf16.vlgmr.msra.gmra.mxu1 %vm1457_vm2, %v4570_v1  ;;  %v2424_v33 = vmul.bf16 %v2392_v41, %v4629_v28  ;;  %v2348_v55 = vadd.bf16 1065369472, %v4791_v30 }
 0x271   : > { %3232 = vtanh.bf16 %v2303_v0  ;;  %2673 = vmatprep.mubr.bf16.mxu1 %v4932_v63  ;;  %v2426_v18 = vmul.bf16 %v2394_v25, %v4635_v52  ;;  %v2408_v8 = vmul.bf16 %v2376_v3, %v4586_v6  ;;  %v2410_v0 = vmul.bf16 %v2378_v51, %v4593_v31 }
 0x272   : > { %3234 = vtanh.bf16 %v2285_v49  ;;  %v2380_v43 = vmul.bf16 1056980736, %v2348_v55 }
 0x273   : > { %3236 = vtanh.bf16 %v2287_v15 }
 0x274   : > { %3238 = vtanh.bf16 %v2286_v42 }
 0x277   : > { %v3219_v59 = vpop.eup %3218 }
 0x278   : > { %v2364_v20 = vadd.bf16 1065369472, %v3219_v59 }
 0x279   : > { %v3221_v61 = vpop.eup %3220 }
 0x27a   : > { %v3223_v58 = vpop.eup %3222  ;;  %v2366_v13 = vadd.bf16 1065369472, %v3221_v61 }
 0x27b   : > { %v3225_v26 = vpop.eup %3224  ;;  %v2361_v38 = vadd.bf16 1065369472, %v3223_v58 }
 0x27c   : > { %v3227_v27 = vpop.eup %3226  ;;  %v2363_v9 = vadd.bf16 1065369472, %v3225_v26  ;;  %v2398_v42 = vmul.bf16 1056980736, %v2366_v13 }
 0x27d   : > { %v3229_v4 = vpop.eup %3228  ;;  %v2393_v62 = vmul.bf16 1056980736, %v2361_v38  ;;  %v2345_v32 = vadd.bf16 1065369472, %v3227_v27 }
 0x27e   : > { %v3231_v35 = vpop.eup %3230  ;;  %v2395_v46 = vmul.bf16 1056980736, %v2363_v9  ;;  %v2347_v53 = vadd.bf16 1065369472, %v3229_v4  ;;  %v2430_v6 = vmul.bf16 %v2398_v42, %v4732_v39 }
 0x27f   : > { %v3233_v16 = vpop.eup %3232  ;;  %v2425_v56 = vmul.bf16 %v2393_v62, %v4642_v21  ;;  %v2377_v24 = vmul.bf16 1056980736, %v2345_v32  ;;  %v2365_v14 = vadd.bf16 1065369472, %v3231_v35 }
 0x280   : > { %v3235_v54 = vpop.eup %3234  ;;  %v2427_v36 = vmul.bf16 %v2395_v46, %v4653_v5  ;;  %v2379_v40 = vmul.bf16 1056980736, %v2347_v53  ;;  %v2367_v12 = vadd.bf16 1065369472, %v3233_v16 }
 0x281   : > { %v3237_v11 = vpop.eup %3236  ;;  %2612 = vmatprep.subr.bf16.mxu0 %v2425_v56  ;;  %v2409_v48 = vmul.bf16 %v2377_v24, %v4601_v34  ;;  %v2397_v28 = vmul.bf16 1056980736, %v2365_v14  ;;  %v2349_v60 = vadd.bf16 1065369472, %v3235_v54  ;;  %v2396_v34 = vmul.bf16 1056980736, %v2364_v20 }
 0x282   : > { %v3239_v47 = vpop.eup %3238  ;;  %2653 = vmatprep.subr.bf16.mxu1 %v2427_v36  ;;  %2613 = vmatpush1.bf16.msra.mxu0 %v2424_v33  ;;  %v2411_v52 = vmul.bf16 %v2379_v40, %v4609_v19  ;;  %v2399_v21 = vmul.bf16 1056980736, %v2367_v12  ;;  %v2351_v22 = vadd.bf16 1065369472, %v3237_v11 }
 0x283   : > { %2654 = vmatpush1.bf16.msra.mxu1 %v2426_v18  ;;  %2614 = vmatprep.subr.bf16.mxu0 %v2409_v48  ;;  %v2429_v5 = vmul.bf16 %v2397_v28, %v4739_v10  ;;  %v2381_v49 = vmul.bf16 1056980736, %v2349_v60  ;;  %v2350_v15 = vadd.bf16 1065369472, %v3239_v47  ;;  %v2428_v10 = vmul.bf16 %v2396_v34, %v4727_v23 }
 0x284   : > { %2655 = vmatprep.subr.bf16.mxu1 %v2411_v52  ;;  %v2431_v7 = vmul.bf16 %v2399_v21, %v4750_v57  ;;  %v2383_v19 = vmul.bf16 1056980736, %v2351_v22  ;;  %v2412_v23 = vmul.bf16 %v2380_v43, %v4678_v29 }
 0x285   : > { %v2413_v57 = vmul.bf16 %v2381_v49, %v4694_v45  ;;  %v2382_v31 = vmul.bf16 1056980736, %v2350_v15 }
 0x286   : > { %2615 = vmatpush1.bf16.msra.mxu0 %v2408_v8  ;;  %v2415_v30 = vmul.bf16 %v2383_v19, %v4701_v17 }
 0x287   : > { %2656 = vmatpush1.bf16.msra.mxu1 %v2410_v0  ;;  %2694 = vmatprep.subr.bf16.mxu0 %v2429_v5  ;;  %v2414_v44 = vmul.bf16 %v2382_v31, %v4686_v50 }
 0x288   : > { %2735 = vmatprep.subr.bf16.mxu1 %v2431_v7 }
 0x289   : > { %3026 = vmatmul.mubr.msk.bf16.vlgmr.msra.gmra.mxu0 %vm1457_vm2, %v4570_v1 }
 0x28a   : > { %3027 = vmatmul.mubr.msk.bf16.vlgmr.msra.gmra.mxu1 %vm1457_vm2, %v4570_v1  ;;  %2695 = vmatpush1.bf16.msra.mxu0 %v2428_v10 }
 0x28b   : > { %2736 = vmatpush1.bf16.msra.mxu1 %v2430_v6  ;;  %2696 = vmatprep.subr.bf16.mxu0 %v2413_v57 }
 0x28c   : > { %2737 = vmatprep.subr.bf16.mxu1 %v2415_v30  ;;  %2714 = vmatprep.mubr.bf16.mxu0 %v4932_v63 }
 0x28d   : > { %2755 = vmatprep.mubr.bf16.mxu1 %v4932_v63 }
 0x28e   : > { %2697 = vmatpush1.bf16.msra.mxu0 %v2412_v23 }
 0x28f   : > { %2738 = vmatpush1.bf16.msra.mxu1 %v2414_v44 }
 0x291   : > { %3028 = vmatmul.mubr.msk.bf16.vlgmr.msra.gmra.mxu0 %vm1457_vm2, %v4570_v1 }
 0x292   : > { %3029 = vmatmul.mubr.msk.bf16.vlgmr.msra.gmra.mxu1 %vm1457_vm2, %v4570_v1 }
 0x302   : > { %v2470_v45 = vpop.f32.mrf.mxu0 }
 0x304   : > { %v2472_v17 = vpop.f32.mrf.mxu0 }
 0x305   : > { %v2780_v39 = vcombine.low %v2470_v45, %v2472_v17 }
 0x306   : > { %v2474_v59 = vpop.f32.mrf.mxu0 }
 0x307   : > { %2796 = vst [vmem:[%s4826_s18] sm:$0xff] %v2780_v39 }
 0x308   : > { %v2475_v63 = vpop.f32.mrf.mxu0 }
 0x309   : > { %v2511_v29 = vpop.f32.mrf.mxu1 }
 0x30b   : > { %v2513_v50 = vpop.f32.mrf.mxu1 }
 0x30c   : > { %v2781_v61 = vcombine.low %v2511_v29, %v2513_v50 }
 0x30d   : > { %v2515_v2 = vpop.f32.mrf.mxu1 }
 0x30e   : > { %2797 = vst [vmem:[%s4826_s18 + $0x8] sm:$0xff] %v2781_v61 }
 0x30f   : > { %v2516_v58 = vpop.f32.mrf.mxu1 }
 0x32d   : > { %v2552_v1 = vpop.f32.mrf.mxu0 }
 0x32f   : > { %v2554_v37 = vpop.f32.mrf.mxu0 }
 0x330   : > { %v2593_v41 = vpop.f32.mrf.mxu1  ;;  %v2782_v26 = vcombine.low %v2552_v1, %v2554_v37 }
 0x331   : > { %v2556_v25 = vpop.f32.mrf.mxu0 }
 0x332   : > { %v2595_v38 = vpop.f32.mrf.mxu1  ;;  %2798 = vst [vmem:[%s4826_s18 + $0x10] sm:$0xff] %v2782_v26 }
 0x333   : > { %v2783_v27 = vcombine.low %v2593_v41, %v2595_v38  ;;  %v2557_v4 = vpop.f32.mrf.mxu0 }
 0x334   : > { %v2597_v9 = vpop.f32.mrf.mxu1 }
 0x335   : > { %2799 = vst [vmem:[%s4826_s18 + $0x18] sm:$0xff] %v2783_v27 }
 0x336   : > { %v2598_v62 = vpop.f32.mrf.mxu1 }
 0x349   : > { %v2634_v32 = vpop.f32.mrf.mxu0 }
 0x34a   : > { %v2675_v3 = vpop.f32.mrf.mxu1 }
 0x34b   : > { %v2636_v35 = vpop.f32.mrf.mxu0 }
 0x34c   : > { %v2784_v46 = vcombine.low %v2634_v32, %v2636_v35  ;;  %v2677_v33 = vpop.f32.mrf.mxu1 }
 0x34d   : > { %v2785_v53 = vcombine.low %v2675_v3, %v2677_v33  ;;  %v2638_v51 = vpop.f32.mrf.mxu0 }
 0x34e   : > { %2800 = vst [vmem:[%s4826_s18 + $0x20] sm:$0xff] %v2784_v46  ;;  %v2679_v16 = vpop.f32.mrf.mxu1 }
 0x34f   : > { %2801 = vst [vmem:[%s4826_s18 + $0x28] sm:$0xff] %v2785_v53  ;;  %v2639_v56 = vpop.f32.mrf.mxu0 }
 0x350   : > { %v2680_v18 = vpop.f32.mrf.mxu1 }
 0x351   : > { %v2716_v24 = vpop.f32.mrf.mxu0 }
 0x352   : > { %v2757_v14 = vpop.f32.mrf.mxu1 }
 0x353   : > { %v2718_v54 = vpop.f32.mrf.mxu0 }
 0x354   : > { %v2786_v36 = vcombine.low %v2716_v24, %v2718_v54  ;;  %v2759_v40 = vpop.f32.mrf.mxu1 }
 0x355   : > { %v2787_v12 = vcombine.low %v2757_v14, %v2759_v40  ;;  %v2720_v20 = vpop.f32.mrf.mxu0 }
 0x356   : > { %2802 = vst [vmem:[%s4826_s18 + $0x30] sm:$0xff] %v2786_v36  ;;  %v2761_v11 = vpop.f32.mrf.mxu1 }
 0x357   : > { %2803 = vst [vmem:[%s4826_s18 + $0x38] sm:$0xff] %v2787_v12  ;;  %v2721_v48 = vpop.f32.mrf.mxu0 }
 0x358   : > { %v2762_v28 = vpop.f32.mrf.mxu1 }
 0x359   : > { %3253 = shalt.err (!%p3250_p7)
}
 0x35a   : > { %s3254_s18 = scalar_lea.hbm %s4840_s13, 1024  ;;  %s3258_s30 = scalar_lea.hbm %s4901_s6, 4096 }
 0x35b   : > { %p3255_p10 = scmp.ne.s32.totalorder %s4840_s13, %s3254_s18  ;;  %p3259_p13 = scmp.lt.s32.totalorder %s4840_s13, %s4901_s6 }
 0x35c   : > { %p3260_p0 = scmp.lt.s32.totalorder %s3258_s30, %s3254_s18 }
 0x35d   : > { %p3256_p11 = pnand %p3255_p10, %p3431_p8 }
 0x35e   : > { %p3261_p1 = por %p3260_p0, %p3259_p13 }
 0x35f   : > { %p3257_p12 = pneg %p3256_p11 }
 0x361   : > { %p3262_p2 = pnand %p3261_p1, %p3257_p12 }
 0x363   : > { %3265 = shalt.err (!%p3262_p2)
}
 0x364   : > { %3036 = dma.vmem_to_hbm [thread:$0]  (%p3431_p8), %s4842_s9, 1024, %s4840_s13, %s2805_s14  }
 0x365 PF: > { %p3042_p3 = scmp.ge.s32.totalorder %s3332_s28, 2  ;;  %s2833_s10 = sand.u32 1, %s3304_s21  }
 0x366   : > { %s2834_s17 = scalar_lea.sflag [#allocation4], %s2833_s10 }
 0x367   : > { %p3039_p4 = pnand %p3042_p3, %p3435_p9 }
 0x369   : > { %p3040_p5 = pneg %p3039_p4 }
 0x36b   : > { %3299 = dma.done.wait (%p3040_p5), %s2834_s17, 1024  }
 0x36c   : > { %3301 = vsyncadd (%p3040_p5), %s2834_s17, 4294966272  ;;  %s19_s28 = sadd.s32 1, %s3332_s28   ;;  %s4962_s21 = smov %s3308_s22 }
 0x36d   : > { %p16_p6 = scmp.ge.s32.totalorder %s19_s28, 6   ;;  %s4963_s22 = smov %s3312_s23 }
 0x36e   : > { %s4964_s23 = smov %s3443_s16  ;;  %s4965_s24 = smov %s3324_s26 }
 0x36f   : > { %s4966_s25 = smov %s3328_s27  ;;  %s4967_s26 = smov %s4970_s7 }
 0x370   : > { %s4968_s27 = smov %s4974_s8  ;;  %18 = sbr.rel (!%p16_p6) target bundleno = 5 (0x5), region = 107 }
 0x375   :  { %2839 = vsyncpa [#allocation4], 1 }
 0x376   :  { %2841 = vsyncpa [#allocation4 + $0x1], 1 }

</bundles_post_ra>
